<compile_context>
chip_gen: v7x
topology: tpu7x:2x2x1
jax: 0.10.0
libtpu: 0.0.40
codegen_flags: <defaults>
</compile_context>

<pallas_src>
import functools

import jax
import jax.numpy as jnp
from jax.experimental import pallas as pl
from jax.experimental.pallas import tpu as pltpu


LANE = 128  # TPU lane width; feature/class/node dims are padded to a multiple of this.


# ------------------------------- fused kernel ------------------------------- #

def fused_graphsage_kernel(a_ref, x_ref, w_ref, b_ref, wn_ref, lab_ref, loss_ref,
                           *, conv_dims, conv_row_offs, lin_row_off, d_out_p, c_p,
                           n_classes):
    """Entire forward pass in one kernel body; everything stays in VMEM/vregs.

      a_ref   : bf16 [Np, Np]        row-normalized mean-aggregation adjacency (padded)
      x_ref   : f32  [Np, D0p]       node features (padded)
      w_ref   : bf16 [Rtot, Wcols]   packed weights: per conv layer the rows
                                     [r0, r0+2*Din_p) hold concat([Wl, Wr], axis=0),
                                     then [lin_row_off, +d_out_p) hold W_lin
      b_ref   : f32  [8, Wcols]      row l = conv-l bias, row n_layers = lin bias
      wn_ref  : f32  [Np, 1]         per-node CE weight = multiplicity_in_batch / B
      lab_ref : i32  [Np, 1]         per-node class label
      loss_ref: f32  [1, 1]          scalar loss (SMEM)
    """
    bf16 = jnp.bfloat16
    f32 = jnp.float32
    n_layers = len(conv_dims)

    h = x_ref[...]                                                  # f32 [Np, D0p]

    # --- SAGEConv layers: mean aggregation + single fused K=256 matmul per layer ---
    for l, (din_p, dout_p) in enumerate(conv_dims):
        hb = h.astype(bf16)
        # Read A from VMEM inside the loop (short vreg live range, no 3-layer hoist).
        agg = jnp.dot(a_ref[...], hb, preferred_element_type=f32).astype(bf16)
        z = jnp.concatenate([agg, hb], axis=-1)                     # bf16 [Np, 2*din_p]
        r0 = conv_row_offs[l]
        w_cat = w_ref[r0:r0 + 2 * din_p, :dout_p]                   # bf16 (static slice)
        h = (jnp.dot(z, w_cat, preferred_element_type=f32)
             + b_ref[l:l + 1, :dout_p])                             # f32 [Np, dout_p]
        if l < n_layers - 1:
            h = jnp.maximum(h, 0.0)                                 # ReLU (f32, VPU)

    # --- head: Linear(out, 2) + Softmax(dim=1) -------------------------------------
    w_lin = w_ref[lin_row_off:lin_row_off + d_out_p, :c_p]
    logits = (jnp.dot(h.astype(bf16), w_lin, preferred_element_type=f32)
              + b_ref[n_layers:n_layers + 1, :c_p])                 # f32 [Np, Cp]

    npad, cpad = logits.shape
    class_iota = jax.lax.broadcasted_iota(jnp.int32, (npad, cpad), 1)
    valid = class_iota < n_classes

    lm = jnp.where(valid, logits, jnp.float32(-1e30))               # mask padded lanes
    m1 = jnp.max(lm, axis=1, keepdims=True)
    e = jnp.exp(lm - m1)                                            # padded lanes -> 0
    denom = jnp.sum(e, axis=1, keepdims=True)
    probs = e * pl.reciprocal(denom, approx=True)                   # softmax probs

    # --- CrossEntropyLoss on the softmax OUTPUTS (double softmax, as in PyTorch) ----
    # probs are in [0, 1] -> exp cannot overflow, so no second max-shift is needed.
    lse = jnp.log(jnp.sum(jnp.where(valid, jnp.exp(probs), 0.0),
                          axis=1, keepdims=True))                   # [Np, 1]
    logp = probs - lse                                              # valid on real lanes

    # Weighted one-hot select built in-kernel from per-node label + weight columns.
    picked = jnp.sum(jnp.where(class_iota == lab_ref[...], logp, 0.0),
                     axis=1, keepdims=True)                         # [Np, 1]
    loss_ref[0, 0] = -jnp.sum(wn_ref[...] * picked)


# ------------------------------ host-side glue ------------------------------ #

def _round_up(n, m):
    return ((n + m - 1) // m) * m


def _pad2(x, rows, cols):
    return jnp.zeros((rows, cols), x.dtype).at[: x.shape[0], : x.shape[1]].set(x)


def build_mean_adjacency(ei, num_nodes):
    # A_mean[i, j] = 1/deg_in(i) for each edge j -> i (PyG 'mean' aggregation).
    src, dst = ei[0], ei[1]
    A = jnp.zeros((num_nodes, num_nodes), jnp.float32).at[dst, src].add(1.0)
    deg = jnp.sum(A, axis=1, keepdims=True)
    return A / jnp.maximum(deg, 1.0)


def graphsage_tg_forward(params, x, ei, batch, labels, n_classes=2):
    N, in_dim = x.shape
    convs = params["convs"]
    n_layers = len(convs)
    Np = _round_up(N, LANE)
    Cp = _round_up(n_classes, LANE)
    D0p = _round_up(in_dim, LANE)

    # Dense mean-aggregation matrix, padded and cast to bf16 for the MXU.
    A_p = _pad2(build_mean_adjacency(ei, N), Np, Np).astype(jnp.bfloat16)
    x_p = _pad2(x, Np, D0p)

    # ---- pack all weights into one bf16 slab (one DMA) ----
    blocks, conv_dims = [], []
    for (wl, wr, b) in convs:
        din, dout = wl.shape
        din_p, dout_p = _round_up(din, LANE), _round_up(dout, LANE)
        wcat = jnp.zeros((2 * din_p, dout_p), jnp.float32)
        wcat = wcat.at[:din, :dout].set(wl)                   # rows [0, din_p): Wl
        wcat = wcat.at[din_p:din_p + din, :dout].set(wr)      # rows [din_p, 2*din_p): Wr
        blocks.append(wcat)
        conv_dims.append((din_p, dout_p))
    d_out = params["lin_w"].shape[0]
    d_out_p = _round_up(d_out, LANE)
    blocks.append(_pad2(params["lin_w"], d_out_p, Cp))

    w_cols = max(blk.shape[1] for blk in blocks)
    rows_total = sum(blk.shape[0] for blk in blocks)
    w_slab = jnp.zeros((rows_total, w_cols), jnp.float32)
    row_offs, r = [], 0
    for blk in blocks:
        row_offs.append(r)
        w_slab = w_slab.at[r:r + blk.shape[0], :blk.shape[1]].set(blk)
        r += blk.shape[0]
    w_slab = w_slab.astype(jnp.bfloat16)

    # ---- pack all biases into one lane-dense f32 slab (one DMA) ----
    b_rows = _round_up(n_layers + 1, 8)
    b_slab = jnp.zeros((b_rows, w_cols), jnp.float32)
    for l, (_, _, b) in enumerate(convs):
        b_slab = b_slab.at[l:l + 1, :b.shape[1]].set(b)
    b_slab = b_slab.at[n_layers:n_layers + 1, :params["lin_b"].shape[1]].set(params["lin_b"])

    # ---- compact CE target: per-node weight (multiplicity/B) + per-node label ----
    B = batch.shape[0]
    w_node = jnp.zeros((Np, 1), jnp.float32).at[batch, 0].add(1.0 / B)
    lab_node = jnp.zeros((Np, 1), jnp.int32).at[:N, 0].set(labels)

    kernel = functools.partial(
        fused_graphsage_kernel,
        conv_dims=tuple(conv_dims),
        conv_row_offs=tuple(row_offs[:n_layers]),
        lin_row_off=row_offs[n_layers],
        d_out_p=d_out_p, c_p=Cp, n_classes=n_classes)

    vmem = pl.BlockSpec(memory_space=pltpu.MemorySpace.VMEM)
    loss_tile = pl.pallas_call(
        kernel,
        out_shape=jax.ShapeDtypeStruct((1, 1), jnp.float32),
        in_specs=[vmem, vmem, vmem, vmem, vmem, vmem],
        out_specs=pl.BlockSpec(memory_space=pltpu.MemorySpace.SMEM),
    )(A_p, x_p, w_slab, b_slab, w_node, lab_node)
    return loss_tile[0, 0]


# --------------------------- params & pure-JAX ref --------------------------- #

def init_params(key, in_dim, hidden, out):
    dims = [(in_dim, hidden), (hidden, hidden), (hidden, out)]
    params = {"convs": []}
    keys = jax.random.split(key, 3 * len(dims) + 2)
    ki = 0
    for (d_in, d_out) in dims:
        s = 1.0 / jnp.sqrt(d_in)
        wl = jax.random.uniform(keys[ki], (d_in, d_out), jnp.float32, -s, s); ki += 1
        wr = jax.random.uniform(keys[ki], (d_in, d_out), jnp.float32, -s, s); ki += 1
        b = jax.random.uniform(keys[ki], (1, d_out), jnp.float32, -s, s); ki += 1
        params["convs"].append((wl, wr, b))
    s = 1.0 / jnp.sqrt(out)
    params["lin_w"] = jax.random.uniform(keys[ki], (out, 2), jnp.float32, -s, s); ki += 1
    params["lin_b"] = jax.random.uniform(keys[ki], (1, 2), jnp.float32, -s, s)
    return params


def reference_forward(params, x, ei, batch, labels):
    """Pure-JAX f32 reference (same math, unpadded) for a sanity check."""
    A = build_mean_adjacency(ei, x.shape[0])
    h = x
    n_layers = len(params["convs"])
    for l, (wl, wr, b) in enumerate(params["convs"]):
        h = (A @ h) @ wl + h @ wr + b
        if l < n_layers - 1:
            h = jnp.maximum(h, 0.0)
    preds = jax.nn.softmax(h @ params["lin_w"] + params["lin_b"], axis=1)
    pb = preds[batch]
    lb = labels[batch]
    logp = jax.nn.log_softmax(pb, axis=1)
    return -jnp.mean(logp[jnp.arange(pb.shape[0]), lb])


# ---------------------------------- main ------------------------------------ #

if __name__ == "__main__":
    in_dim, hidden, out = 8, 32, 16
    N, E, B = 16, 40, 8

    key = jax.random.PRNGKey(0)
    k_x, k_src, k_dst, k_lab, k_batch, k_par = jax.random.split(key, 6)

    x = jax.random.normal(k_x, (N, in_dim), jnp.float32)
    src = jax.random.randint(k_src, (E,), 0, N, jnp.int32)
    dst = jax.random.randint(k_dst, (E,), 0, N, jnp.int32)
    ei = jnp.stack([src, dst], axis=0)                   # [2, E]
    labels = jax.random.randint(k_lab, (N,), 0, 2, jnp.int32)
    batch = jax.random.permutation(k_batch, N)[:B]       # node indices to score

    params = init_params(k_par, in_dim, hidden, out)

    loss = graphsage_tg_forward(params, x, ei, batch, labels)
    jax.block_until_ready(loss)

    ref = reference_forward(params, x, ei, batch, labels)
    assert jnp.isfinite(loss), "loss is not finite"
    assert abs(float(loss) - float(ref)) < 5e-2, (float(loss), float(ref))
    print("KERNEL_OK")
</pallas_src>

<mosaic_0001>
module attributes {stable_mosaic.version = 11 : i64} {
  func.func @fused_graphsage_kernel(%arg0: memref<128x128xbf16, #tpu.memory_space<vmem>>, %arg1: memref<128x128xf32, #tpu.memory_space<vmem>>, %arg2: memref<896x128xbf16, #tpu.memory_space<vmem>>, %arg3: memref<8x128xf32, #tpu.memory_space<vmem>>, %arg4: memref<128x1xf32, #tpu.memory_space<vmem>>, %arg5: memref<128x1xi32, #tpu.memory_space<vmem>>, %arg6: memref<1x1xf32, #tpu.memory_space<smem>>) attributes {dimension_semantics = [], scalar_prefetch = 0 : i64, scratch_operands = 0 : i64, tpu.core_type = #tpu.core_type<tc>} {
    %c0 = arith.constant 0 : index
    %c0_0 = arith.constant 0 : index
    %0 = vector.load %arg1[%c0, %c0_0] : memref<128x128xf32, #tpu.memory_space<vmem>>, vector<128x128xf32>
    %1 = arith.truncf %0 : vector<128x128xf32> to vector<128x128xbf16>
    %c0_1 = arith.constant 0 : index
    %c0_2 = arith.constant 0 : index
    %2 = vector.load %arg0[%c0_1, %c0_2] : memref<128x128xbf16, #tpu.memory_space<vmem>>, vector<128x128xbf16>
    %cst = arith.constant dense<0.000000e+00> : vector<128x128xf32>
    %3 = tpu.matmul %2, %1, %cst {dimension_numbers = #tpu.dot_dimension_numbers<[1], [0], [0], [1], [0, 0, 1, 1], [], []>} : vector<128x128xbf16>, vector<128x128xbf16>, vector<128x128xf32> -> vector<128x128xf32>
    %4 = arith.truncf %3 : vector<128x128xf32> to vector<128x128xbf16>
    %5 = tpu.concatenate %4, %1 in 1 : vector<128x128xbf16>, vector<128x128xbf16> -> vector<128x256xbf16>
    %c0_3 = arith.constant 0 : index
    %c0_4 = arith.constant 0 : index
    %6 = vector.load %arg2[%c0_3, %c0_4] : memref<896x128xbf16, #tpu.memory_space<vmem>>, vector<256x128xbf16>
    %cst_5 = arith.constant dense<0.000000e+00> : vector<128x128xf32>
    %7 = tpu.matmul %5, %6, %cst_5 {dimension_numbers = #tpu.dot_dimension_numbers<[1], [0], [0], [1], [0, 0, 1, 1], [], []>} : vector<128x256xbf16>, vector<256x128xbf16>, vector<128x128xf32> -> vector<128x128xf32>
    %c0_6 = arith.constant 0 : index
    %c0_7 = arith.constant 0 : index
    %8 = vector.load %arg3[%c0_6, %c0_7] : memref<8x128xf32, #tpu.memory_space<vmem>>, vector<1x128xf32>
    %9 = vector.broadcast %8 : vector<1x128xf32> to vector<128x128xf32>
    %10 = arith.addf %7, %9 : vector<128x128xf32>
    %cst_8 = arith.constant 0.000000e+00 : f32
    %11 = vector.broadcast %cst_8 : f32 to vector<128x128xf32>
    %12 = arith.maximumf %10, %11 : vector<128x128xf32>
    %13 = arith.truncf %12 : vector<128x128xf32> to vector<128x128xbf16>
    %c0_9 = arith.constant 0 : index
    %c0_10 = arith.constant 0 : index
    %14 = vector.load %arg0[%c0_9, %c0_10] : memref<128x128xbf16, #tpu.memory_space<vmem>>, vector<128x128xbf16>
    %cst_11 = arith.constant dense<0.000000e+00> : vector<128x128xf32>
    %15 = tpu.matmul %14, %13, %cst_11 {dimension_numbers = #tpu.dot_dimension_numbers<[1], [0], [0], [1], [0, 0, 1, 1], [], []>} : vector<128x128xbf16>, vector<128x128xbf16>, vector<128x128xf32> -> vector<128x128xf32>
    %16 = arith.truncf %15 : vector<128x128xf32> to vector<128x128xbf16>
    %17 = tpu.concatenate %16, %13 in 1 : vector<128x128xbf16>, vector<128x128xbf16> -> vector<128x256xbf16>
    %c256 = arith.constant 256 : index
    %c0_12 = arith.constant 0 : index
    %18 = vector.load %arg2[%c256, %c0_12] : memref<896x128xbf16, #tpu.memory_space<vmem>>, vector<256x128xbf16>
    %cst_13 = arith.constant dense<0.000000e+00> : vector<128x128xf32>
    %19 = tpu.matmul %17, %18, %cst_13 {dimension_numbers = #tpu.dot_dimension_numbers<[1], [0], [0], [1], [0, 0, 1, 1], [], []>} : vector<128x256xbf16>, vector<256x128xbf16>, vector<128x128xf32> -> vector<128x128xf32>
    %c1 = arith.constant 1 : index
    %c0_14 = arith.constant 0 : index
    %20 = vector.load %arg3[%c1, %c0_14] : memref<8x128xf32, #tpu.memory_space<vmem>>, vector<1x128xf32>
    %21 = vector.broadcast %20 : vector<1x128xf32> to vector<128x128xf32>
    %22 = arith.addf %19, %21 : vector<128x128xf32>
    %cst_15 = arith.constant 0.000000e+00 : f32
    %23 = vector.broadcast %cst_15 : f32 to vector<128x128xf32>
    %24 = arith.maximumf %22, %23 : vector<128x128xf32>
    %25 = arith.truncf %24 : vector<128x128xf32> to vector<128x128xbf16>
    %c0_16 = arith.constant 0 : index
    %c0_17 = arith.constant 0 : index
    %26 = vector.load %arg0[%c0_16, %c0_17] : memref<128x128xbf16, #tpu.memory_space<vmem>>, vector<128x128xbf16>
    %cst_18 = arith.constant dense<0.000000e+00> : vector<128x128xf32>
    %27 = tpu.matmul %26, %25, %cst_18 {dimension_numbers = #tpu.dot_dimension_numbers<[1], [0], [0], [1], [0, 0, 1, 1], [], []>} : vector<128x128xbf16>, vector<128x128xbf16>, vector<128x128xf32> -> vector<128x128xf32>
    %28 = arith.truncf %27 : vector<128x128xf32> to vector<128x128xbf16>
    %29 = tpu.concatenate %28, %25 in 1 : vector<128x128xbf16>, vector<128x128xbf16> -> vector<128x256xbf16>
    %c512 = arith.constant 512 : index
    %c0_19 = arith.constant 0 : index
    %30 = vector.load %arg2[%c512, %c0_19] : memref<896x128xbf16, #tpu.memory_space<vmem>>, vector<256x128xbf16>
    %cst_20 = arith.constant dense<0.000000e+00> : vector<128x128xf32>
    %31 = tpu.matmul %29, %30, %cst_20 {dimension_numbers = #tpu.dot_dimension_numbers<[1], [0], [0], [1], [0, 0, 1, 1], [], []>} : vector<128x256xbf16>, vector<256x128xbf16>, vector<128x128xf32> -> vector<128x128xf32>
    %c2 = arith.constant 2 : index
    %c0_21 = arith.constant 0 : index
    %32 = vector.load %arg3[%c2, %c0_21] : memref<8x128xf32, #tpu.memory_space<vmem>>, vector<1x128xf32>
    %33 = vector.broadcast %32 : vector<1x128xf32> to vector<128x128xf32>
    %34 = arith.addf %31, %33 : vector<128x128xf32>
    %c768 = arith.constant 768 : index
    %c0_22 = arith.constant 0 : index
    %35 = vector.load %arg2[%c768, %c0_22] : memref<896x128xbf16, #tpu.memory_space<vmem>>, vector<128x128xbf16>
    %36 = arith.truncf %34 : vector<128x128xf32> to vector<128x128xbf16>
    %cst_23 = arith.constant dense<0.000000e+00> : vector<128x128xf32>
    %37 = tpu.matmul %36, %35, %cst_23 {dimension_numbers = #tpu.dot_dimension_numbers<[1], [0], [0], [1], [0, 0, 1, 1], [], []>} : vector<128x128xbf16>, vector<128x128xbf16>, vector<128x128xf32> -> vector<128x128xf32>
    %c3 = arith.constant 3 : index
    %c0_24 = arith.constant 0 : index
    %38 = vector.load %arg3[%c3, %c0_24] : memref<8x128xf32, #tpu.memory_space<vmem>>, vector<1x128xf32>
    %39 = vector.broadcast %38 : vector<1x128xf32> to vector<128x128xf32>
    %40 = arith.addf %37, %39 : vector<128x128xf32>
    %41 = tpu.iota {dimensions = array<i32: 1>} : vector<128x128xi32>
    %c2_i32 = arith.constant 2 : i32
    %42 = vector.broadcast %c2_i32 : i32 to vector<128x128xi32>
    %43 = arith.cmpi slt, %41, %42 : vector<128x128xi32>
    %cst_25 = arith.constant -1.000000e+30 : f32
    %44 = vector.broadcast %cst_25 : f32 to vector<128x128xf32>
    %45 = arith.select %43, %40, %44 : vector<128x128xi1>, vector<128x128xf32>
    %cst_26 = arith.constant dense<0xFF800000> : vector<128xf32>
    %46 = vector.multi_reduction <maximumf>, %45, %cst_26 [1] : vector<128x128xf32> to vector<128xf32>
    %47 = vector.shape_cast %46 : vector<128xf32> to vector<128x1xf32>
    %48 = vector.broadcast %47 : vector<128x1xf32> to vector<128x128xf32>
    %49 = arith.subf %45, %48 : vector<128x128xf32>
    %50 = math.exp %49 : vector<128x128xf32>
    %cst_27 = arith.constant dense<0.000000e+00> : vector<128xf32>
    %51 = vector.multi_reduction <add>, %50, %cst_27 [1] : vector<128x128xf32> to vector<128xf32>
    %52 = vector.shape_cast %51 : vector<128xf32> to vector<128x1xf32>
    %53 = tpu.reciprocal %52 {approx = true} : vector<128x1xf32> -> vector<128x1xf32>
    %54 = vector.broadcast %53 : vector<128x1xf32> to vector<128x128xf32>
    %55 = arith.mulf %50, %54 : vector<128x128xf32>
    %56 = math.exp %55 : vector<128x128xf32>
    %cst_28 = arith.constant 0.000000e+00 : f32
    %57 = vector.broadcast %cst_28 : f32 to vector<128x128xf32>
    %58 = arith.select %43, %56, %57 : vector<128x128xi1>, vector<128x128xf32>
    %cst_29 = arith.constant dense<0.000000e+00> : vector<128xf32>
    %59 = vector.multi_reduction <add>, %58, %cst_29 [1] : vector<128x128xf32> to vector<128xf32>
    %60 = vector.shape_cast %59 : vector<128xf32> to vector<128x1xf32>
    %61 = math.log %60 : vector<128x1xf32>
    %62 = vector.broadcast %61 : vector<128x1xf32> to vector<128x128xf32>
    %63 = arith.subf %55, %62 : vector<128x128xf32>
    %c0_30 = arith.constant 0 : index
    %c0_31 = arith.constant 0 : index
    %64 = vector.load %arg5[%c0_30, %c0_31] : memref<128x1xi32, #tpu.memory_space<vmem>>, vector<128x1xi32>
    %65 = vector.broadcast %64 : vector<128x1xi32> to vector<128x128xi32>
    %66 = arith.cmpi eq, %41, %65 : vector<128x128xi32>
    %cst_32 = arith.constant 0.000000e+00 : f32
    %67 = vector.broadcast %cst_32 : f32 to vector<128x128xf32>
    %68 = arith.select %66, %63, %67 : vector<128x128xi1>, vector<128x128xf32>
    %cst_33 = arith.constant dense<0.000000e+00> : vector<128xf32>
    %69 = vector.multi_reduction <add>, %68, %cst_33 [1] : vector<128x128xf32> to vector<128xf32>
    %70 = vector.shape_cast %69 : vector<128xf32> to vector<128x1xf32>
    %c0_34 = arith.constant 0 : index
    %c0_35 = arith.constant 0 : index
    %71 = vector.load %arg4[%c0_34, %c0_35] : memref<128x1xf32, #tpu.memory_space<vmem>>, vector<128x1xf32>
    %72 = arith.mulf %71, %70 : vector<128x1xf32>
    %73 = vector.shape_cast %72 : vector<128x1xf32> to vector<1x128x1xf32>
    %cst_36 = arith.constant dense<0.000000e+00> : vector<1xf32>
    %74 = vector.multi_reduction <add>, %73, %cst_36 [1, 2] : vector<1x128x1xf32> to vector<1xf32>
    %75 = vector.shape_cast %74 : vector<1xf32> to vector<1x1x1xf32>
    %76 = vector.extract %75[0, 0, 0] : f32 from vector<1x1x1xf32>
    %cst_37 = arith.constant 0.000000e+00 : f32
    %77 = arith.subf %cst_37, %76 : f32
    %c0_38 = arith.constant 0 : index
    %c0_39 = arith.constant 0 : index
    %78 = memref.load %arg6[%c0_38, %c0_39] : memref<1x1xf32, #tpu.memory_space<smem>>
    memref.store %77, %arg6[%c0_38, %c0_39] : memref<1x1xf32, #tpu.memory_space<smem>>
    return
  }
}

</mosaic_0001>

<bundles_post_ra>
// kernel: tpu_custom_call.1
= control target key start
LH: loop header
LB: loop body
LE: loop exit
PB: predicated region body
PF: predicated region fallthrough
CT: control target
= control target key end

     0   :  { %11 = vsyncpa [#allocation3], 0  ;;  %s3335_s0 = inlined_call_operand.vmem [shape: bf16[128,128], index: 0, kind: input, shape index: {}]   ;;  %s3336_s1 = inlined_call_operand.vmem [shape: f32[128,128], index: 1, kind: input, shape index: {}]   ;;  %s3337_s2 = inlined_call_operand.hbm [shape: bf16[896,128], index: 2, kind: input, shape index: {}]   ;;  %s3338_s3 = inlined_call_operand.vmem [shape: f32[8,128], index: 3, kind: input, shape index: {}]   ;;  %s3339_s4 = inlined_call_operand.vmem [shape: f32[128,1], index: 4, kind: input, shape index: {}]   ;;  %s3340_s5 = inlined_call_operand.vmem [shape: s32[128,1], index: 5, kind: input, shape index: {}]   ;;  %s3341_s6 = inlined_call_operand.hbm [shape: f32[1,1], index: 6, kind: output, shape index: {}]  }
   0x1   :  { %12 = vsyncpa [#allocation4], 0  ;;  %s2552_s21 = smov [#allocation2]   ;;  %s2516_s25 = scalar_lea.hbm %s3337_s2, 7168 }
   0x2   :  { %s22_s22 = sshll.u32 %s2552_s21, 4  ;;  %p2517_p0 = scmp.ne.s32.totalorder %s3337_s2, %s2516_s25  ;;  %s23_s22 = int_to_ptr.vmem [resolvable:$true] %s22_s22 }
   0x3   :  { %p2520_p1 = scmp.lt.u32.totalorder %s2516_s25, %s3337_s2 }
   0x5   :  { %p2522_p2 = pnand %p2520_p1, %p2517_p0 }
   0x7   :  { %2525 = shalt.err (!%p2522_p2)
}
   0x8   :  { %s2526_s30 = scalar_lea.vmem %s23_s22, 7168  ;;  %p2531_p4 = scmp.lt.s32.totalorder %s23_s22, %s23_s22 }
   0x9   :  { %p2527_p3 = scmp.ne.s32.totalorder %s23_s22, %s2526_s30  ;;  %p2532_p5 = scmp.lt.s32.totalorder %s2526_s30, %s2526_s30 }
   0xb   :  { %p2533_p6 = por %p2532_p5, %p2531_p4 }
   0xd   :  { %p2534_p7 = pnand %p2533_p6, %p2527_p3 }
   0xf   :  { %2537 = shalt.err (!%p2534_p7)
}
  0x10   :  { %s2553_s7 = smov 64   ;;  %s2554_s8 = smov 4  }
  0x11   :  { %28 = dma.hbm_to_vmem [thread:$0]  %s3337_s2, 7168, %s23_s22, [#allocation3], %s2553_s7, %s2553_s7, %s2554_s8  }
  0x12   :  { %2548 = dma.done.wait [#allocation3], 7168  }
  0x13   :  { %2549 = vsyncadd [#allocation3], 4294960128  ;;  %v39_v0 = vld [vmem:[%s3336_s1] sm:$0xff]  ;;  %v40_v1 = vld [vmem:[%s3336_s1 + $0x8] sm:$0xff]  ;;  %s2538_s21 = scalar_lea.hbm %s3341_s6, 16 }
  0x14   :  { %v41_v2 = vld [vmem:[%s3336_s1 + $0x10] sm:$0xff]  ;;  %v55_v3 = vpack.c.bf16 %v40_v1, %v39_v0  ;;  %v42_v4 = vld [vmem:[%s3336_s1 + $0x18] sm:$0xff]  ;;  %v43_v6 = vld [vmem:[%s3336_s1 + $0x20] sm:$0xff]  ;;  %p2539_p8 = scmp.ne.s32.totalorder %s3341_s6, %s2538_s21  ;;  %p2542_p9 = scmp.lt.u32.totalorder %s2538_s21, %s3341_s6 }
  0x15   :  { %v2616_v5 = vpack.c.bf16 %v42_v4, %v41_v2  ;;  %v44_v7 = vld [vmem:[%s3336_s1 + $0x28] sm:$0xff]  ;;  %v45_v8 = vld [vmem:[%s3336_s1 + $0x30] sm:$0xff]  ;;  %v46_v10 = vld [vmem:[%s3336_s1 + $0x38] sm:$0xff] }
  0x16   :  { %2187 = vmatprep.subr.bf16.mxu0 %v55_v3  ;;  %397 = vmatprep.mubr.bf16.mxu1 %v55_v3  ;;  %v2628_v9 = vpack.c.bf16 %v44_v7, %v43_v6  ;;  %v2636_v11 = vld [vmem:[%s3335_s0] sm:$0xff]   ;;  %v2641_v12 = vpack.c.bf16 %v46_v10, %v45_v8  ;;  %v48_v14 = vld [vmem:[%s3336_s1 + $0x48] sm:$0xff]  ;;  %v49_v15 = vld [vmem:[%s3336_s1 + $0x50] sm:$0xff]  ;;  %p2544_p10 = pnand %p2542_p9, %p2539_p8 }
  0x17   :  { %2188 = vmatpush3.bf16.msra.mxu0 %v55_v3  ;;  %2203 = vmatprep.mubr.bf16.mxu0 %v2636_v11  ;;  %v47_v13 = vld [vmem:[%s3336_s1 + $0x40] sm:$0xff]  ;;  %v50_v17 = vld [vmem:[%s3336_s1 + $0x58] sm:$0xff]  ;;  %v52_v21 = vld [vmem:[%s3336_s1 + $0x68] sm:$0xff] }
  0x18   :  { %2189 = vmatprep.subr.bf16.mxu0 %v2616_v5  ;;  %v2654_v16 = vpack.c.bf16 %v48_v14, %v47_v13  ;;  %v2332_v18 = vld [vmem:[#allocation2 + $0x40] sm:$0xff]   ;;  %v2334_v22 = vld [vmem:[#allocation2 + $0x48] sm:$0xff]   ;;  %v2667_v23 = vpack.c.bf16 %v50_v17, %v49_v15  ;;  %v2336_v25 = vld [vmem:[#allocation2 + $0x50] sm:$0xff]  }
  0x19   :  { %v2333_v19 = vld [vmem:[#allocation2] sm:$0xff]   ;;  %1947 = vmatprep.subr.bf16.mxu1 %v2332_v18  ;;  %v2335_v24 = vld [vmem:[#allocation2 + $0x8] sm:$0xff]   ;;  %v53_v26 = vld [vmem:[%s3336_s1 + $0x70] sm:$0xff] }
  0x1a   :  { %v51_v20 = vld [vmem:[%s3336_s1 + $0x60] sm:$0xff]  ;;  %1948 = vmatpush3.bf16.msra.mxu1 %v2333_v19  ;;  %v54_v27 = vld [vmem:[%s3336_s1 + $0x78] sm:$0xff]  ;;  %v2337_v29 = vld [vmem:[#allocation2 + $0x10] sm:$0xff]  }
  0x1b   :  { %2190 = vmatpush3.bf16.msra.mxu0 %v2616_v5  ;;  %1949 = vmatprep.subr.bf16.mxu1 %v2334_v22  ;;  %v2677_v28 = vpack.c.bf16 %v52_v21, %v51_v20  ;;  %v2338_v30 = vld [vmem:[#allocation2 + $0x58] sm:$0xff]   ;;  %v2681_v31 = vpack.c.bf16 %v54_v27, %v53_v26  ;;  %v2340_v33 = vld [vmem:[#allocation2 + $0x60] sm:$0xff]   ;;  %v2342_v35 = vld [vmem:[#allocation2 + $0x68] sm:$0xff]  }
  0x1c   :  { %2191 = vmatprep.subr.bf16.mxu0 %v2628_v9  ;;  %v2339_v32 = vld [vmem:[#allocation2 + $0x18] sm:$0xff]   ;;  %v2341_v34 = vld [vmem:[#allocation2 + $0x20] sm:$0xff]   ;;  %v2688_v36 = vld [vmem:[%s3335_s0 + $0x8] sm:$0xff]  }
  0x1d   :  { %v2693_v37 = vld [vmem:[%s3335_s0 + $0x10] sm:$0xff]   ;;  %v2343_v38 = vld [vmem:[#allocation2 + $0x28] sm:$0xff]   ;;  %v2701_v41 = vld [vmem:[%s3335_s0 + $0x18] sm:$0xff]  }
  0x1e   :  { %1950 = vmatpush3.bf16.msra.mxu1 %v2335_v24  ;;  %v2344_v39 = vld [vmem:[#allocation2 + $0x70] sm:$0xff]   ;;  %v2706_v42 = vld [vmem:[%s3335_s0 + $0x20] sm:$0xff]   ;;  %v2713_v43 = vld [vmem:[%s3335_s0 + $0x28] sm:$0xff]  }
  0x1f   :  { %2192 = vmatpush3.bf16.msra.mxu0 %v2628_v9  ;;  %1951 = vmatprep.subr.bf16.mxu1 %v2336_v25  ;;  %v2345_v40 = vld [vmem:[#allocation2 + $0x30] sm:$0xff]   ;;  %v2725_v45 = vld [vmem:[%s3335_s0 + $0x38] sm:$0xff]  }
  0x20   :  { %2193 = vmatprep.subr.bf16.mxu0 %v2641_v12  ;;  %v2718_v44 = vld [vmem:[%s3335_s0 + $0x30] sm:$0xff]   ;;  %v2346_v46 = vld [vmem:[#allocation2 + $0x78] sm:$0xff]  }
  0x21   :  { %v2347_v47 = vld [vmem:[#allocation2 + $0x38] sm:$0xff]  }
  0x22   :  { %1952 = vmatpush3.bf16.msra.mxu1 %v2337_v29 }
  0x23   :  { %2194 = vmatpush3.bf16.msra.mxu0 %v2641_v12  ;;  %1953 = vmatprep.subr.bf16.mxu1 %v2338_v30 }
  0x24   :  { %2195 = vmatprep.subr.bf16.mxu0 %v2654_v16 }
  0x26   :  { %1954 = vmatpush3.bf16.msra.mxu1 %v2339_v32 }
  0x27   :  { %2196 = vmatpush3.bf16.msra.mxu0 %v2654_v16  ;;  %1955 = vmatprep.subr.bf16.mxu1 %v2340_v33 }
  0x28   :  { %2197 = vmatprep.subr.bf16.mxu0 %v2667_v23 }
  0x2a   :  { %1956 = vmatpush3.bf16.msra.mxu1 %v2341_v34 }
  0x2b   :  { %2198 = vmatpush3.bf16.msra.mxu0 %v2667_v23  ;;  %1957 = vmatprep.subr.bf16.mxu1 %v2342_v35 }
  0x2c   :  { %2199 = vmatprep.subr.bf16.mxu0 %v2677_v28 }
  0x2e   :  { %1958 = vmatpush3.bf16.msra.mxu1 %v2343_v38 }
  0x2f   :  { %2200 = vmatpush3.bf16.msra.mxu0 %v2677_v28  ;;  %1959 = vmatprep.subr.bf16.mxu1 %v2344_v39 }
  0x30   :  { %2201 = vmatprep.subr.bf16.mxu0 %v2681_v31 }
  0x32   :  { %1960 = vmatpush3.bf16.msra.mxu1 %v2345_v40 }
  0x33   :  { %2202 = vmatpush3.bf16.msra.mxu0 %v2681_v31  ;;  %1961 = vmatprep.subr.bf16.mxu1 %v2346_v46 }
  0x36   :  { %2204 = vmatmul.mubr.bf16.vlgmr.msra.gmra.mrb[0].mxu0 %v2688_v36  ;;  %1962 = vmatpush3.bf16.msra.mxu1 %v2347_v47 }
  0x37   :  { %2207 = vmatprep.mubr.bf16.mxu0 %v2693_v37 }
  0x3e   :  { %2208 = vmatmul.mubr.bf16.gmra.mrb[4].mxu0 %v2701_v41 }
  0x3f   :  { %2211 = vmatprep.mubr.bf16.mxu0 %v2706_v42 }
  0x46   :  { %2212 = vmatmul.mubr.bf16.gmra.mrb[8].mxu0 %v2713_v43 }
  0x47   :  { %2215 = vmatprep.mubr.bf16.mxu0 %v2718_v44 }
  0x4e   :  { %2216 = vmatmul.mubr.bf16.gmra.mrb[12].mxu0 %v2725_v45 }
  0x4f   :  { %2235 = vmatprep.mubr.bf16.mxu0 %v2636_v11 }
 0x109   :  { %v2205_v48 = vpop.f32.mrb[0].mxu0 }
 0x10a   :  { %v161_v49 = vpop.f32.mrb[1].mxu0 }
 0x10b   :  { %v2206_v50 = vpop.f32.mrb[2].mxu0 }
 0x10c   :  { %v225_v51 = vpack.c.bf16 %v2206_v50, %v2205_v48  ;;  %v164_v52 = vpop.f32.mrb[3].mxu0 }
 0x10d   :  { %v224_v53 = vpack.c.bf16 %v164_v52, %v161_v49 }
 0x10f   :  { %398 = vmatmul.mubr.bf16.vlgmr.msra.gmra.mrb[0].mxu1 %v224_v53 }
 0x110   :  { %405 = vmatprep.mubr.bf16.mxu1 %v2616_v5 }
 0x111   :  { %v2209_v54 = vpop.f32.mrb[4].mxu0 }
 0x112   :  { %v177_v55 = vpop.f32.mrb[5].mxu0 }
 0x113   :  { %v2210_v56 = vpop.f32.mrb[6].mxu0 }
 0x114   :  { %v227_v57 = vpack.c.bf16 %v2210_v56, %v2209_v54  ;;  %v180_v58 = vpop.f32.mrb[7].mxu0 }
 0x115   :  { %v226_v59 = vpack.c.bf16 %v180_v58, %v177_v55 }
 0x117   :  { %406 = vmatmul.mubr.bf16.gmra.mrb[4].mxu1 %v225_v51 }
 0x118   :  { %413 = vmatprep.mubr.bf16.mxu1 %v2628_v9  ;;  %v2740_v9 = vld [vmem:[%s3338_s3] ss:$0 sm:$0xff] }
 0x119   :  { %v2213_v60 = vpop.f32.mrb[8].mxu0 }
 0x11a   :  { %v193_v61 = vpop.f32.mrb[9].mxu0 }
 0x11b   :  { %v2214_v62 = vpop.f32.mrb[10].mxu0 }
 0x11c   :  { %v229_v63 = vpack.c.bf16 %v2214_v62, %v2213_v60  ;;  %v196_v0 = vpop.f32.mrb[11].mxu0 }
 0x11d   :  { %v228_v1 = vpack.c.bf16 %v196_v0, %v193_v61 }
 0x11f   :  { %414 = vmatmul.mubr.bf16.gmra.mrb[8].mxu1 %v226_v59 }
 0x120   :  { %421 = vmatprep.mubr.bf16.mxu1 %v2641_v12 }
 0x121   :  { %v2217_v2 = vpop.f32.mrb[12].mxu0 }
 0x122   :  { %v209_v3 = vpop.f32.mrb[13].mxu0 }
 0x123   :  { %v2218_v4 = vpop.f32.mrb[14].mxu0 }
 0x124   :  { %v231_v5 = vpack.c.bf16 %v2218_v4, %v2217_v2  ;;  %v212_v6 = vpop.f32.mrb[15].mxu0 }
 0x125   :  { %v230_v7 = vpack.c.bf16 %v212_v6, %v209_v3 }
 0x127   :  { %422 = vmatmul.mubr.bf16.gmra.mrb[12].mxu1 %v227_v57 }
 0x128   :  { %429 = vmatprep.mubr.bf16.mxu1 %v2654_v16 }
 0x12f   :  { %430 = vmatmul.mubr.bf16.gmra.mrb[16].mxu1 %v228_v1 }
 0x130   :  { %437 = vmatprep.mubr.bf16.mxu1 %v2667_v23 }
 0x137   :  { %438 = vmatmul.mubr.bf16.gmra.mrb[20].mxu1 %v229_v63 }
 0x138   :  { %445 = vmatprep.mubr.bf16.mxu1 %v2677_v28 }
 0x13f   :  { %446 = vmatmul.mubr.bf16.gmra.mrb[24].mxu1 %v230_v7 }
 0x140   :  { %453 = vmatprep.mubr.bf16.mxu1 %v2681_v31 }
 0x147   :  { %454 = vmatmul.mubr.bf16.gmra.mrb[28].mxu1 %v231_v5 }
 0x148   :  { %2267 = vmatprep.mubr.bf16.mxu1 %v2636_v11 }
 0x1e2   :  { %v1963_v8 = vpop.f32.mrb[0].mxu1 }
 0x1e3   :  { %v1964_v10 = vpop.f32.mrb[1].mxu1 }
 0x1e4   :  { %v1965_v12 = vadd.f32 %v1964_v10, %v1963_v8  ;;  %v1966_v13 = vpop.f32.mrb[2].mxu1 }
 0x1e5   :  { %v1967_v14 = vpop.f32.mrb[3].mxu1 }
 0x1e6   :  { %v400_v15 = vadd.f32 %v1965_v12, %v2740_v9  ;;  %v1968_v16 = vadd.f32 %v1967_v14, %v1966_v13 }
 0x1e8   :  { %v403_v17 = vadd.f32 %v1968_v16, %v2740_v9  ;;  %v462_v18 = vmax.f32 %v400_v15, 0.0 }
 0x1ea   :  { %v463_v19 = vmax.f32 %v403_v17, 0.0  ;;  %v1969_v20 = vpop.f32.mrb[4].mxu1 }
 0x1eb   :  { %v1970_v21 = vpop.f32.mrb[5].mxu1 }
 0x1ec   :  { %v1971_v11 = vadd.f32 %v1970_v21, %v1969_v20  ;;  %v1972_v22 = vpop.f32.mrb[6].mxu1  ;;  %v2744_v23 = vpack.c.bf16 %v463_v19, %v462_v18 }
 0x1ed   :  { %v1973_v24 = vpop.f32.mrb[7].mxu1 }
 0x1ee   :  { %v408_v25 = vadd.f32 %v1971_v11, %v2740_v9  ;;  %v1974_v26 = vadd.f32 %v1973_v24, %v1972_v22  ;;  %2219 = vmatprep.subr.bf16.mxu0 %v2744_v23 }
 0x1ef   :  { %2220 = vmatpush3.bf16.msra.mxu0 %v2744_v23 }
 0x1f0   :  { %v411_v27 = vadd.f32 %v1974_v26, %v2740_v9  ;;  %v464_v28 = vmax.f32 %v408_v25, 0.0 }
 0x1f2   :  { %v465_v29 = vmax.f32 %v411_v27, 0.0  ;;  %v1975_v30 = vpop.f32.mrb[8].mxu1 }
 0x1f3   :  { %v1976_v31 = vpop.f32.mrb[9].mxu1 }
 0x1f4   :  { %v1977_v32 = vadd.f32 %v1976_v31, %v1975_v30  ;;  %v1978_v33 = vpop.f32.mrb[10].mxu1  ;;  %v2750_v34 = vpack.c.bf16 %v465_v29, %v464_v28 }
 0x1f5   :  { %v1979_v35 = vpop.f32.mrb[11].mxu1 }
 0x1f6   :  { %v416_v38 = vadd.f32 %v1977_v32, %v2740_v9  ;;  %v1980_v39 = vadd.f32 %v1979_v35, %v1978_v33  ;;  %2221 = vmatprep.subr.bf16.mxu0 %v2750_v34 }
 0x1f7   :  { %2222 = vmatpush3.bf16.msra.mxu0 %v2750_v34 }
 0x1f8   :  { %v419_v40 = vadd.f32 %v1980_v39, %v2740_v9  ;;  %v466_v46 = vmax.f32 %v416_v38, 0.0 }
 0x1fa   :  { %v467_v47 = vmax.f32 %v419_v40, 0.0  ;;  %v1981_v48 = vpop.f32.mrb[12].mxu1 }
 0x1fb   :  { %v1982_v49 = vpop.f32.mrb[13].mxu1 }
 0x1fc   :  { %v1983_v50 = vadd.f32 %v1982_v49, %v1981_v48  ;;  %v1984_v51 = vpop.f32.mrb[14].mxu1  ;;  %v2756_v52 = vpack.c.bf16 %v467_v47, %v466_v46 }
 0x1fd   :  { %v1985_v53 = vpop.f32.mrb[15].mxu1 }
 0x1fe   :  { %v424_v54 = vadd.f32 %v1983_v50, %v2740_v9  ;;  %v1986_v55 = vadd.f32 %v1985_v53, %v1984_v51  ;;  %2223 = vmatprep.subr.bf16.mxu0 %v2756_v52  ;;  %v2348_v50 = vld [vmem:[#allocation2 + $0xc0] sm:$0xff]   ;;  %v2350_v53 = vld [vmem:[#allocation2 + $0xc8] sm:$0xff]  }
 0x1ff   :  { %2224 = vmatpush3.bf16.msra.mxu0 %v2756_v52  ;;  %v2349_v51 = vld [vmem:[#allocation2 + $0x80] sm:$0xff]  }
 0x200   :  { %v427_v56 = vadd.f32 %v1986_v55, %v2740_v9  ;;  %v468_v57 = vmax.f32 %v424_v54, 0.0  ;;  %v2351_v54 = vld [vmem:[#allocation2 + $0x88] sm:$0xff]   ;;  %v2353_v55 = vld [vmem:[#allocation2 + $0x90] sm:$0xff]  }
 0x202   :  { %v469_v58 = vmax.f32 %v427_v56, 0.0  ;;  %v1987_v59 = vpop.f32.mrb[16].mxu1  ;;  %v2354_v56 = vld [vmem:[#allocation2 + $0xd8] sm:$0xff]  }
 0x203   :  { %v1988_v60 = vpop.f32.mrb[17].mxu1 }
 0x204   :  { %v1989_v61 = vadd.f32 %v1988_v60, %v1987_v59  ;;  %v1990_v62 = vpop.f32.mrb[18].mxu1  ;;  %v2762_v63 = vpack.c.bf16 %v469_v58, %v468_v57  ;;  %v2355_v57 = vld [vmem:[#allocation2 + $0x98] sm:$0xff]   ;;  %v2356_v58 = vld [vmem:[#allocation2 + $0xe0] sm:$0xff]   ;;  %v2358_v60 = vld [vmem:[#allocation2 + $0xe8] sm:$0xff]  }
 0x205   :  { %v1991_v0 = vpop.f32.mrb[19].mxu1  ;;  %v2357_v59 = vld [vmem:[#allocation2 + $0xa0] sm:$0xff]  }
 0x206   :  { %v432_v1 = vadd.f32 %v1989_v61, %v2740_v9  ;;  %v1992_v2 = vadd.f32 %v1991_v0, %v1990_v62  ;;  %2225 = vmatprep.subr.bf16.mxu0 %v2762_v63  ;;  %v2359_v61 = vld [vmem:[#allocation2 + $0xa8] sm:$0xff]   ;;  %v2360_v62 = vld [vmem:[#allocation2 + $0xf0] sm:$0xff]  }
 0x207   :  { %2226 = vmatpush3.bf16.msra.mxu0 %v2762_v63  ;;  %v2361_v0 = vld [vmem:[#allocation2 + $0xb0] sm:$0xff]  }
 0x208   :  { %v435_v3 = vadd.f32 %v1992_v2, %v2740_v9  ;;  %v470_v4 = vmax.f32 %v432_v1, 0.0  ;;  %v2362_v1 = vld [vmem:[#allocation2 + $0xf8] sm:$0xff]  }
 0x209   :  { %v2363_v2 = vld [vmem:[#allocation2 + $0xb8] sm:$0xff]  }
 0x20a   :  { %v471_v5 = vmax.f32 %v435_v3, 0.0  ;;  %v1993_v6 = vpop.f32.mrb[20].mxu1 }
 0x20b   :  { %v1994_v7 = vpop.f32.mrb[21].mxu1 }
 0x20c   :  { %v1995_v8 = vadd.f32 %v1994_v7, %v1993_v6  ;;  %v1996_v10 = vpop.f32.mrb[22].mxu1  ;;  %v2768_v12 = vpack.c.bf16 %v471_v5, %v470_v4 }
 0x20d   :  { %v1997_v13 = vpop.f32.mrb[23].mxu1 }
 0x20e   :  { %v440_v14 = vadd.f32 %v1995_v8, %v2740_v9  ;;  %v1998_v15 = vadd.f32 %v1997_v13, %v1996_v10  ;;  %2227 = vmatprep.subr.bf16.mxu0 %v2768_v12 }
 0x20f   :  { %2228 = vmatpush3.bf16.msra.mxu0 %v2768_v12 }
 0x210   :  { %v443_v16 = vadd.f32 %v1998_v15, %v2740_v9  ;;  %v472_v17 = vmax.f32 %v440_v14, 0.0 }
 0x212   :  { %v473_v18 = vmax.f32 %v443_v16, 0.0  ;;  %v1999_v19 = vpop.f32.mrb[24].mxu1 }
 0x213   :  { %v2000_v20 = vpop.f32.mrb[25].mxu1 }
 0x214   :  { %v2001_v21 = vadd.f32 %v2000_v20, %v1999_v19  ;;  %v2002_v11 = vpop.f32.mrb[26].mxu1  ;;  %v2774_v22 = vpack.c.bf16 %v473_v18, %v472_v17 }
 0x215   :  { %v2003_v24 = vpop.f32.mrb[27].mxu1 }
 0x216   :  { %v448_v25 = vadd.f32 %v2001_v21, %v2740_v9  ;;  %v2004_v26 = vadd.f32 %v2003_v24, %v2002_v11  ;;  %2229 = vmatprep.subr.bf16.mxu0 %v2774_v22 }
 0x217   :  { %2230 = vmatpush3.bf16.msra.mxu0 %v2774_v22 }
 0x218   :  { %v451_v27 = vadd.f32 %v2004_v26, %v2740_v9  ;;  %v474_v28 = vmax.f32 %v448_v25, 0.0 }
 0x21a   :  { %v475_v29 = vmax.f32 %v451_v27, 0.0  ;;  %v2005_v30 = vpop.f32.mrb[28].mxu1 }
 0x21b   :  { %v2006_v31 = vpop.f32.mrb[29].mxu1 }
 0x21c   :  { %v2007_v32 = vadd.f32 %v2006_v31, %v2005_v30  ;;  %v2008_v33 = vpop.f32.mrb[30].mxu1  ;;  %v2780_v35 = vpack.c.bf16 %v475_v29, %v474_v28 }
 0x21d   :  { %v2009_v38 = vpop.f32.mrb[31].mxu1 }
 0x21e   :  { %v456_v39 = vadd.f32 %v2007_v32, %v2740_v9  ;;  %v2010_v40 = vadd.f32 %v2009_v38, %v2008_v33  ;;  %2231 = vmatprep.subr.bf16.mxu0 %v2780_v35 }
 0x21f   :  { %2232 = vmatpush3.bf16.msra.mxu0 %v2780_v35 }
 0x220   :  { %v459_v46 = vadd.f32 %v2010_v40, %v2740_v9  ;;  %v476_v47 = vmax.f32 %v456_v39, 0.0  ;;  %v2352_v9 = vld [vmem:[#allocation2 + $0xd0] sm:$0xff]  }
 0x222   :  { %v477_v48 = vmax.f32 %v459_v46, 0.0 }
 0x224   :  { %v2786_v49 = vpack.c.bf16 %v477_v48, %v476_v47 }
 0x226   :  { %2233 = vmatprep.subr.bf16.mxu0 %v2786_v49 }
 0x227   :  { %2234 = vmatpush3.bf16.msra.mxu0 %v2786_v49 }
 0x228   :  { %2027 = vmatprep.subr.bf16.mxu0 %v2348_v50 }
 0x22a   :  { %2236 = vmatmul.mubr.bf16.vlgmr.msra.gmra.mrb[16].mxu0 %v2688_v36 }
 0x22b   :  { %2239 = vmatprep.mubr.bf16.mxu0 %v2693_v37  ;;  %2028 = vmatpush3.bf16.msra.mxu0 %v2349_v51 }
 0x22c   :  { %2029 = vmatprep.subr.bf16.mxu0 %v2350_v53 }
 0x22f   :  { %2030 = vmatpush3.bf16.msra.mxu0 %v2351_v54 }
 0x230   :  { %2031 = vmatprep.subr.bf16.mxu0 %v2352_v9 }
 0x232   :  { %2240 = vmatmul.mubr.bf16.gmra.mrb[20].mxu0 %v2701_v41 }
 0x233   :  { %2243 = vmatprep.mubr.bf16.mxu0 %v2706_v42  ;;  %2032 = vmatpush3.bf16.msra.mxu0 %v2353_v55 }
 0x234   :  { %2033 = vmatprep.subr.bf16.mxu0 %v2354_v56 }
 0x237   :  { %2034 = vmatpush3.bf16.msra.mxu0 %v2355_v57 }
 0x238   :  { %2035 = vmatprep.subr.bf16.mxu0 %v2356_v58 }
 0x23a   :  { %2244 = vmatmul.mubr.bf16.gmra.mrb[24].mxu0 %v2713_v43 }
 0x23b   :  { %2247 = vmatprep.mubr.bf16.mxu0 %v2718_v44  ;;  %2036 = vmatpush3.bf16.msra.mxu0 %v2357_v59 }
 0x23c   :  { %2037 = vmatprep.subr.bf16.mxu0 %v2358_v60 }
 0x23f   :  { %2038 = vmatpush3.bf16.msra.mxu0 %v2359_v61 }
 0x240   :  { %2039 = vmatprep.subr.bf16.mxu0 %v2360_v62 }
 0x242   :  { %2248 = vmatmul.mubr.bf16.gmra.mrb[28].mxu0 %v2725_v45 }
 0x243   :  { %756 = vmatprep.mubr.bf16.mxu0 %v2744_v23  ;;  %2040 = vmatpush3.bf16.msra.mxu0 %v2361_v0 }
 0x244   :  { %2041 = vmatprep.subr.bf16.mxu0 %v2362_v1 }
 0x247   :  { %2042 = vmatpush3.bf16.msra.mxu0 %v2363_v2 }
 0x2fd   :  { %v2237_v3 = vpop.f32.mrb[16].mxu0 }
 0x2fe   :  { %v520_v4 = vpop.f32.mrb[17].mxu0 }
 0x2ff   :  { %v2238_v5 = vpop.f32.mrb[18].mxu0 }
 0x300   :  { %v584_v6 = vpack.c.bf16 %v2238_v5, %v2237_v3  ;;  %v523_v7 = vpop.f32.mrb[19].mxu0 }
 0x301   :  { %v583_v8 = vpack.c.bf16 %v523_v7, %v520_v4 }
 0x303   :  { %757 = vmatmul.mubr.bf16.vlgmr.msra.gmra.mrb[32].mxu0 %v583_v8 }
 0x304   :  { %764 = vmatprep.mubr.bf16.mxu0 %v2750_v34 }
 0x305   :  { %v2241_v10 = vpop.f32.mrb[20].mxu0 }
 0x306   :  { %v536_v13 = vpop.f32.mrb[21].mxu0 }
 0x307   :  { %v2242_v14 = vpop.f32.mrb[22].mxu0 }
 0x308   :  { %v586_v15 = vpack.c.bf16 %v2242_v14, %v2241_v10  ;;  %v539_v16 = vpop.f32.mrb[23].mxu0 }
 0x309   :  { %v585_v23 = vpack.c.bf16 %v539_v16, %v536_v13 }
 0x30b   :  { %765 = vmatmul.mubr.bf16.gmra.mrb[36].mxu0 %v584_v6 }
 0x30c   :  { %772 = vmatprep.mubr.bf16.mxu0 %v2756_v52 }
 0x30d   :  { %v2245_v17 = vpop.f32.mrb[24].mxu0 }
 0x30e   :  { %v552_v18 = vpop.f32.mrb[25].mxu0 }
 0x30f   :  { %v2246_v19 = vpop.f32.mrb[26].mxu0 }
 0x310   :  { %v588_v20 = vpack.c.bf16 %v2246_v19, %v2245_v17  ;;  %v555_v21 = vpop.f32.mrb[27].mxu0 }
 0x311   :  { %v587_v11 = vpack.c.bf16 %v555_v21, %v552_v18 }
 0x313   :  { %773 = vmatmul.mubr.bf16.gmra.mrb[40].mxu0 %v585_v23 }
 0x314   :  { %780 = vmatprep.mubr.bf16.mxu0 %v2762_v63  ;;  %v2808_v63 = vld [vmem:[%s3338_s3 + $0x1] ss:$0 sm:$0xff] }
 0x315   :  { %v2249_v24 = vpop.f32.mrb[28].mxu0 }
 0x316   :  { %v568_v34 = vpop.f32.mrb[29].mxu0 }
 0x317   :  { %v2250_v25 = vpop.f32.mrb[30].mxu0 }
 0x318   :  { %v590_v26 = vpack.c.bf16 %v2250_v25, %v2249_v24  ;;  %v571_v27 = vpop.f32.mrb[31].mxu0 }
 0x319   :  { %v589_v28 = vpack.c.bf16 %v571_v27, %v568_v34 }
 0x31b   :  { %781 = vmatmul.mubr.bf16.gmra.mrb[44].mxu0 %v586_v15 }
 0x31c   :  { %788 = vmatprep.mubr.bf16.mxu0 %v2768_v12 }
 0x323   :  { %789 = vmatmul.mubr.bf16.gmra.mrb[48].mxu0 %v587_v11 }
 0x324   :  { %796 = vmatprep.mubr.bf16.mxu0 %v2774_v22 }
 0x32b   :  { %797 = vmatmul.mubr.bf16.gmra.mrb[52].mxu0 %v588_v20 }
 0x32c   :  { %804 = vmatprep.mubr.bf16.mxu0 %v2780_v35 }
 0x333   :  { %805 = vmatmul.mubr.bf16.gmra.mrb[56].mxu0 %v589_v28 }
 0x334   :  { %812 = vmatprep.mubr.bf16.mxu0 %v2786_v49 }
 0x33b   :  { %813 = vmatmul.mubr.bf16.gmra.mrb[60].mxu0 %v590_v26 }
 0x3d6   :  { %v2043_v52 = vpop.f32.mrb[32].mxu0 }
 0x3d7   :  { %v2044_v29 = vpop.f32.mrb[33].mxu0 }
 0x3d8   :  { %v2045_v30 = vadd.f32 %v2044_v29, %v2043_v52  ;;  %v2046_v31 = vpop.f32.mrb[34].mxu0 }
 0x3d9   :  { %v2047_v12 = vpop.f32.mrb[35].mxu0 }
 0x3da   :  { %v759_v32 = vadd.f32 %v2045_v30, %v2808_v63  ;;  %v2048_v22 = vadd.f32 %v2047_v12, %v2046_v31 }
 0x3dc   :  { %v762_v33 = vadd.f32 %v2048_v22, %v2808_v63  ;;  %v821_v35 = vmax.f32 %v759_v32, 0.0 }
 0x3de   :  { %v822_v38 = vmax.f32 %v762_v33, 0.0  ;;  %v2049_v39 = vpop.f32.mrb[36].mxu0 }
 0x3df   :  { %v2050_v40 = vpop.f32.mrb[37].mxu0 }
 0x3e0   :  { %v2051_v46 = vadd.f32 %v2050_v40, %v2049_v39  ;;  %v2052_v47 = vpop.f32.mrb[38].mxu0  ;;  %v2812_v48 = vpack.c.bf16 %v822_v38, %v821_v35 }
 0x3e1   :  { %v2053_v49 = vpop.f32.mrb[39].mxu0 }
 0x3e2   :  { %v767_v50 = vadd.f32 %v2051_v46, %v2808_v63  ;;  %v2054_v51 = vadd.f32 %v2053_v49, %v2052_v47  ;;  %2251 = vmatprep.subr.bf16.mxu1 %v2812_v48 }
 0x3e3   :  { %2252 = vmatpush3.bf16.msra.mxu1 %v2812_v48 }
 0x3e4   :  { %v770_v53 = vadd.f32 %v2054_v51, %v2808_v63  ;;  %v823_v54 = vmax.f32 %v767_v50, 0.0 }
 0x3e6   :  { %v824_v9 = vmax.f32 %v770_v53, 0.0  ;;  %v2055_v55 = vpop.f32.mrb[40].mxu0 }
 0x3e7   :  { %v2056_v56 = vpop.f32.mrb[41].mxu0 }
 0x3e8   :  { %v2057_v57 = vadd.f32 %v2056_v56, %v2055_v55  ;;  %v2058_v58 = vpop.f32.mrb[42].mxu0  ;;  %v2818_v59 = vpack.c.bf16 %v824_v9, %v823_v54 }
 0x3e9   :  { %v2059_v60 = vpop.f32.mrb[43].mxu0 }
 0x3ea   :  { %v775_v61 = vadd.f32 %v2057_v57, %v2808_v63  ;;  %v2060_v62 = vadd.f32 %v2059_v60, %v2058_v58  ;;  %2253 = vmatprep.subr.bf16.mxu1 %v2818_v59 }
 0x3eb   :  { %2254 = vmatpush3.bf16.msra.mxu1 %v2818_v59 }
 0x3ec   :  { %v778_v0 = vadd.f32 %v2060_v62, %v2808_v63  ;;  %v825_v1 = vmax.f32 %v775_v61, 0.0 }
 0x3ee   :  { %v826_v2 = vmax.f32 %v778_v0, 0.0  ;;  %v2061_v3 = vpop.f32.mrb[44].mxu0 }
 0x3ef   :  { %v2062_v4 = vpop.f32.mrb[45].mxu0 }
 0x3f0   :  { %v2063_v5 = vadd.f32 %v2062_v4, %v2061_v3  ;;  %v2064_v6 = vpop.f32.mrb[46].mxu0  ;;  %v2824_v7 = vpack.c.bf16 %v826_v2, %v825_v1 }
 0x3f1   :  { %v2065_v8 = vpop.f32.mrb[47].mxu0 }
 0x3f2   :  { %v783_v10 = vadd.f32 %v2063_v5, %v2808_v63  ;;  %v2066_v13 = vadd.f32 %v2065_v8, %v2064_v6  ;;  %2255 = vmatprep.subr.bf16.mxu1 %v2824_v7  ;;  %v2364_v5 = vld [vmem:[#allocation2 + $0x140] sm:$0xff]   ;;  %v2366_v8 = vld [vmem:[#allocation2 + $0x148] sm:$0xff]  }
 0x3f3   :  { %2256 = vmatpush3.bf16.msra.mxu1 %v2824_v7  ;;  %v2365_v6 = vld [vmem:[#allocation2 + $0x100] sm:$0xff]  }
 0x3f4   :  { %v786_v14 = vadd.f32 %v2066_v13, %v2808_v63  ;;  %v827_v15 = vmax.f32 %v783_v10, 0.0  ;;  %v2367_v10 = vld [vmem:[#allocation2 + $0x108] sm:$0xff]   ;;  %v2369_v13 = vld [vmem:[#allocation2 + $0x110] sm:$0xff]  }
 0x3f6   :  { %v828_v16 = vmax.f32 %v786_v14, 0.0  ;;  %v2067_v23 = vpop.f32.mrb[48].mxu0  ;;  %v2370_v14 = vld [vmem:[#allocation2 + $0x158] sm:$0xff]  }
 0x3f7   :  { %v2068_v17 = vpop.f32.mrb[49].mxu0 }
 0x3f8   :  { %v2069_v18 = vadd.f32 %v2068_v17, %v2067_v23  ;;  %v2070_v19 = vpop.f32.mrb[50].mxu0  ;;  %v2830_v20 = vpack.c.bf16 %v828_v16, %v827_v15  ;;  %v2371_v15 = vld [vmem:[#allocation2 + $0x118] sm:$0xff]   ;;  %v2372_v16 = vld [vmem:[#allocation2 + $0x160] sm:$0xff]   ;;  %v2375_v23 = vld [vmem:[#allocation2 + $0x128] sm:$0xff]  }
 0x3f9   :  { %v2071_v21 = vpop.f32.mrb[51].mxu0  ;;  %v2376_v17 = vld [vmem:[#allocation2 + $0x170] sm:$0xff]  }
 0x3fa   :  { %v791_v11 = vadd.f32 %v2069_v18, %v2808_v63  ;;  %v2072_v24 = vadd.f32 %v2071_v21, %v2070_v19  ;;  %2257 = vmatprep.subr.bf16.mxu1 %v2830_v20  ;;  %v2379_v18 = vld [vmem:[#allocation2 + $0x138] sm:$0xff]   ;;  %v2380_v19 = vld [vmem:[#allocation2 + $0x180] sm:$0xff]  }
 0x3fb   :  { %2258 = vmatpush3.bf16.msra.mxu1 %v2830_v20  ;;  %2283 = vmatprep.subr.bf16.mxu0 %v2380_v19  ;;  %v2383_v21 = vld [vmem:[#allocation2 + $0x198] sm:$0xff]  }
 0x3fc   :  { %v794_v34 = vadd.f32 %v2072_v24, %v2808_v63  ;;  %v829_v25 = vmax.f32 %v791_v11, 0.0  ;;  %2284 = vmatpush3.bf16.msra.mxu0 %v2380_v19 }
 0x3fe   :  { %v830_v26 = vmax.f32 %v794_v34, 0.0  ;;  %v2073_v27 = vpop.f32.mrb[52].mxu0 }
 0x3ff   :  { %v2074_v28 = vpop.f32.mrb[53].mxu0 }
 0x400   :  { %v2075_v52 = vadd.f32 %v2074_v28, %v2073_v27  ;;  %v2076_v29 = vpop.f32.mrb[54].mxu0  ;;  %v2836_v30 = vpack.c.bf16 %v830_v26, %v829_v25 }
 0x401   :  { %v2077_v31 = vpop.f32.mrb[55].mxu0 }
 0x402   :  { %v799_v12 = vadd.f32 %v2075_v52, %v2808_v63  ;;  %v2078_v32 = vadd.f32 %v2077_v31, %v2076_v29  ;;  %2259 = vmatprep.subr.bf16.mxu1 %v2836_v30 }
 0x403   :  { %2260 = vmatpush3.bf16.msra.mxu1 %v2836_v30 }
 0x404   :  { %v802_v22 = vadd.f32 %v2078_v32, %v2808_v63  ;;  %v831_v33 = vmax.f32 %v799_v12, 0.0 }
 0x406   :  { %v832_v35 = vmax.f32 %v802_v22, 0.0  ;;  %v2079_v38 = vpop.f32.mrb[56].mxu0 }
 0x407   :  { %v2080_v39 = vpop.f32.mrb[57].mxu0 }
 0x408   :  { %v2081_v40 = vadd.f32 %v2080_v39, %v2079_v38  ;;  %v2082_v46 = vpop.f32.mrb[58].mxu0  ;;  %v2842_v47 = vpack.c.bf16 %v832_v35, %v831_v33 }
 0x409   :  { %v2083_v49 = vpop.f32.mrb[59].mxu0 }
 0x40a   :  { %v807_v50 = vadd.f32 %v2081_v40, %v2808_v63  ;;  %v2084_v51 = vadd.f32 %v2083_v49, %v2082_v46  ;;  %2261 = vmatprep.subr.bf16.mxu1 %v2842_v47 }
 0x40b   :  { %2262 = vmatpush3.bf16.msra.mxu1 %v2842_v47 }
 0x40c   :  { %v810_v53 = vadd.f32 %v2084_v51, %v2808_v63  ;;  %v833_v54 = vmax.f32 %v807_v50, 0.0  ;;  %v2386_v51 = vld [vmem:[#allocation2 + $0x1b0] sm:$0xff]  }
 0x40e   :  { %v834_v9 = vmax.f32 %v810_v53, 0.0  ;;  %v2085_v55 = vpop.f32.mrb[60].mxu0 }
 0x40f   :  { %v2086_v56 = vpop.f32.mrb[61].mxu0 }
 0x410   :  { %v2087_v57 = vadd.f32 %v2086_v56, %v2085_v55  ;;  %v2088_v58 = vpop.f32.mrb[62].mxu0  ;;  %v2848_v60 = vpack.c.bf16 %v834_v9, %v833_v54  ;;  %v2876_v55 = vld [vmem:[%s3338_s3 + $0x2] ss:$0 sm:$0xff] }
 0x411   :  { %v2089_v61 = vpop.f32.mrb[63].mxu0 }
 0x412   :  { %v815_v62 = vadd.f32 %v2087_v57, %v2808_v63  ;;  %v2090_v0 = vadd.f32 %v2089_v61, %v2088_v58  ;;  %2263 = vmatprep.subr.bf16.mxu1 %v2848_v60 }
 0x413   :  { %2264 = vmatpush3.bf16.msra.mxu1 %v2848_v60 }
 0x414   :  { %v818_v1 = vadd.f32 %v2090_v0, %v2808_v63  ;;  %v835_v2 = vmax.f32 %v815_v62, 0.0  ;;  %v2368_v63 = vld [vmem:[#allocation2 + $0x150] sm:$0xff]  }
 0x416   :  { %v836_v3 = vmax.f32 %v818_v1, 0.0 }
 0x418   :  { %v2854_v4 = vpack.c.bf16 %v836_v3, %v835_v2 }
 0x41a   :  { %2265 = vmatprep.subr.bf16.mxu1 %v2854_v4 }
 0x41b   :  { %2266 = vmatpush3.bf16.msra.mxu1 %v2854_v4 }
 0x41c   :  { %2107 = vmatprep.subr.bf16.mxu1 %v2364_v5 }
 0x41e   :  { %2268 = vmatmul.mubr.bf16.vlgmr.msra.gmra.mrb[32].mxu1 %v2688_v36  ;;  %v2373_v36 = vld [vmem:[#allocation2 + $0x120] sm:$0xff]  }
 0x41f   :  { %2271 = vmatprep.mubr.bf16.mxu1 %v2693_v37  ;;  %2108 = vmatpush3.bf16.msra.mxu1 %v2365_v6  ;;  %v2374_v37 = vld [vmem:[#allocation2 + $0x168] sm:$0xff]  }
 0x420   :  { %2109 = vmatprep.subr.bf16.mxu1 %v2366_v8 }
 0x423   :  { %2110 = vmatpush3.bf16.msra.mxu1 %v2367_v10 }
 0x424   :  { %2111 = vmatprep.subr.bf16.mxu1 %v2368_v63 }
 0x426   :  { %2272 = vmatmul.mubr.bf16.gmra.mrb[36].mxu1 %v2701_v41  ;;  %v2377_v41 = vld [vmem:[#allocation2 + $0x130] sm:$0xff]  }
 0x427   :  { %2275 = vmatprep.mubr.bf16.mxu1 %v2706_v42  ;;  %2112 = vmatpush3.bf16.msra.mxu1 %v2369_v13  ;;  %v2378_v42 = vld [vmem:[#allocation2 + $0x178] sm:$0xff]  }
 0x428   :  { %2113 = vmatprep.subr.bf16.mxu1 %v2370_v14 }
 0x42b   :  { %2114 = vmatpush3.bf16.msra.mxu1 %v2371_v15 }
 0x42c   :  { %2115 = vmatprep.subr.bf16.mxu1 %v2372_v16 }
 0x42e   :  { %2276 = vmatmul.mubr.bf16.gmra.mrb[40].mxu1 %v2713_v43  ;;  %v2381_v43 = vld [vmem:[#allocation2 + $0x188] sm:$0xff]  }
 0x42f   :  { %2279 = vmatprep.mubr.bf16.mxu1 %v2718_v44  ;;  %2116 = vmatpush3.bf16.msra.mxu1 %v2373_v36  ;;  %v2382_v44 = vld [vmem:[#allocation2 + $0x190] sm:$0xff]  }
 0x430   :  { %2117 = vmatprep.subr.bf16.mxu1 %v2374_v37  ;;  %2285 = vmatprep.subr.bf16.mxu0 %v2381_v43 }
 0x431   :  { %2286 = vmatpush3.bf16.msra.mxu0 %v2381_v43 }
 0x432   :  { %2287 = vmatprep.subr.bf16.mxu0 %v2382_v44 }
 0x433   :  { %2118 = vmatpush3.bf16.msra.mxu1 %v2375_v23 }
 0x434   :  { %2119 = vmatprep.subr.bf16.mxu1 %v2376_v17 }
 0x435   :  { %2288 = vmatpush3.bf16.msra.mxu0 %v2382_v44 }
 0x436   :  { %2280 = vmatmul.mubr.bf16.gmra.mrb[44].mxu1 %v2725_v45  ;;  %2289 = vmatprep.subr.bf16.mxu0 %v2383_v21 }
 0x437   :  { %1115 = vmatprep.mubr.bf16.mxu1 %v2812_v48  ;;  %2120 = vmatpush3.bf16.msra.mxu1 %v2377_v41 }
 0x438   :  { %2121 = vmatprep.subr.bf16.mxu1 %v2378_v42 }
 0x439   :  { %2290 = vmatpush3.bf16.msra.mxu0 %v2383_v21 }
 0x43b   :  { %2122 = vmatpush3.bf16.msra.mxu1 %v2379_v18 }
 0x4f1   :  { %v2269_v45 = vpop.f32.mrb[32].mxu1 }
 0x4f2   :  { %v879_v11 = vpop.f32.mrb[33].mxu1 }
 0x4f3   :  { %v2270_v48 = vpop.f32.mrb[34].mxu1 }
 0x4f4   :  { %v943_v24 = vpack.c.bf16 %v2270_v48, %v2269_v45  ;;  %v882_v34 = vpop.f32.mrb[35].mxu1 }
 0x4f5   :  { %v942_v25 = vpack.c.bf16 %v882_v34, %v879_v11 }
 0x4f7   :  { %1116 = vmatmul.mubr.bf16.vlgmr.msra.gmra.mrb[48].mxu1 %v942_v25 }
 0x4f8   :  { %1123 = vmatprep.mubr.bf16.mxu1 %v2818_v59 }
 0x4f9   :  { %v2273_v26 = vpop.f32.mrb[36].mxu1 }
 0x4fa   :  { %v895_v27 = vpop.f32.mrb[37].mxu1 }
 0x4fb   :  { %v2274_v28 = vpop.f32.mrb[38].mxu1 }
 0x4fc   :  { %v945_v52 = vpack.c.bf16 %v2274_v28, %v2273_v26  ;;  %v898_v29 = vpop.f32.mrb[39].mxu1 }
 0x4fd   :  { %v944_v31 = vpack.c.bf16 %v898_v29, %v895_v27 }
 0x4ff   :  { %1124 = vmatmul.mubr.bf16.gmra.mrb[52].mxu1 %v943_v24 }
 0x500   :  { %1131 = vmatprep.mubr.bf16.mxu1 %v2824_v7  ;;  %v2384_v7 = vld [vmem:[#allocation2 + $0x1a0] sm:$0xff]  }
 0x501   :  { %v2277_v12 = vpop.f32.mrb[40].mxu1  ;;  %2291 = vmatprep.subr.bf16.mxu0 %v2384_v7 }
 0x502   :  { %v911_v32 = vpop.f32.mrb[41].mxu1  ;;  %2292 = vmatpush3.bf16.msra.mxu0 %v2384_v7 }
 0x503   :  { %v2278_v22 = vpop.f32.mrb[42].mxu1 }
 0x504   :  { %v947_v33 = vpack.c.bf16 %v2278_v22, %v2277_v12  ;;  %v914_v35 = vpop.f32.mrb[43].mxu1 }
 0x505   :  { %v946_v38 = vpack.c.bf16 %v914_v35, %v911_v32 }
 0x507   :  { %1132 = vmatmul.mubr.bf16.gmra.mrb[56].mxu1 %v944_v31 }
 0x508   :  { %1139 = vmatprep.mubr.bf16.mxu1 %v2830_v20  ;;  %v2385_v20 = vld [vmem:[#allocation2 + $0x1a8] sm:$0xff]  }
 0x509   :  { %v2281_v39 = vpop.f32.mrb[44].mxu1  ;;  %2293 = vmatprep.subr.bf16.mxu0 %v2385_v20 }
 0x50a   :  { %v927_v59 = vpop.f32.mrb[45].mxu1  ;;  %2294 = vmatpush3.bf16.msra.mxu0 %v2385_v20 }
 0x50b   :  { %v2282_v40 = vpop.f32.mrb[46].mxu1  ;;  %2295 = vmatprep.subr.bf16.mxu0 %v2386_v51 }
 0x50c   :  { %v949_v46 = vpack.c.bf16 %v2282_v40, %v2281_v39  ;;  %v930_v49 = vpop.f32.mrb[47].mxu1 }
 0x50d   :  { %v948_v50 = vpack.c.bf16 %v930_v49, %v927_v59 }
 0x50e   :  { %2296 = vmatpush3.bf16.msra.mxu0 %v2386_v51 }
 0x50f   :  { %1140 = vmatmul.mubr.bf16.gmra.mrb[60].mxu1 %v945_v52 }
 0x510   :  { %1147 = vmatprep.mubr.bf16.mxu1 %v2836_v30  ;;  %v2387_v30 = vld [vmem:[#allocation2 + $0x1b8] sm:$0xff]  }
 0x511   :  { %2297 = vmatprep.subr.bf16.mxu0 %v2387_v30 }
 0x512   :  { %2298 = vmatpush3.bf16.msra.mxu0 %v2387_v30 }
 0x517   :  { %1148 = vmatmul.mubr.bf16.gmra.mrb[64].mxu1 %v946_v38 }
 0x518   :  { %1155 = vmatprep.mubr.bf16.mxu1 %v2842_v47 }
 0x51f   :  { %1156 = vmatmul.mubr.bf16.gmra.mrb[68].mxu1 %v947_v33 }
 0x520   :  { %1163 = vmatprep.mubr.bf16.mxu1 %v2848_v60 }
 0x527   :  { %1164 = vmatmul.mubr.bf16.gmra.mrb[72].mxu1 %v948_v50 }
 0x528   :  { %1171 = vmatprep.mubr.bf16.mxu1 %v2854_v4 }
 0x52f   :  { %1172 = vmatmul.mubr.bf16.gmra.mrb[76].mxu1 %v949_v46 }
 0x5ca   :  { %v2123_v47 = vpop.f32.mrb[48].mxu1 }
 0x5cb   :  { %v2124_v53 = vpop.f32.mrb[49].mxu1 }
 0x5cc   :  { %v2125_v54 = vadd.f32 %v2124_v53, %v2123_v47  ;;  %v2126_v9 = vpop.f32.mrb[50].mxu1 }
 0x5cd   :  { %v2127_v56 = vpop.f32.mrb[51].mxu1 }
 0x5ce   :  { %v2128_v57 = vadd.f32 %v2127_v56, %v2126_v9  ;;  %v1118_v58 = vadd.f32 %v2125_v54, %v2876_v55 }
 0x5d0   :  { %v1121_v60 = vadd.f32 %v2128_v57, %v2876_v55 }
 0x5d2   :  { %v2129_v61 = vpop.f32.mrb[52].mxu1  ;;  %v1196_v62 = vpack.c.bf16 %v1121_v60, %v1118_v58 }
 0x5d3   :  { %v2130_v0 = vpop.f32.mrb[53].mxu1 }
 0x5d4   :  { %v2131_v1 = vadd.f32 %v2130_v0, %v2129_v61  ;;  %v2132_v2 = vpop.f32.mrb[54].mxu1  ;;  %2299 = vmatprep.mubr.bf16.mxu0 %v1196_v62  ;;  %v2555_v62 = vmov 0   ;;  %v1354_v0 = vlaneseq }
 0x5d5   :  { %v2133_v3 = vpop.f32.mrb[55].mxu1  ;;  %2323 = vset.pattern.permute.xlu1 %v2555_v62  ;;  %2322 = vset.pattern.permute.xlu0 %v2555_v62 }
 0x5d6   :  { %v2134_v4 = vadd.f32 %v2133_v3, %v2132_v2  ;;  %v1126_v5 = vadd.f32 %v2131_v1, %v2876_v55  ;;  %v2894_v1 = vand.u32 127, %v1354_v0  ;;  %v1922_v2 = vld [vmem:[%s3338_s3 + $0x3] ss:$0 sm:$0xff] }
 0x5d8   :  { %v1129_v6 = vadd.f32 %v2134_v4, %v2876_v55  ;;  %vm1356_vm0 = vcmp.lt.s32.totalorder %v2894_v1, 2 }
 0x5da   :  { %v1197_v8 = vpack.c.bf16 %v1129_v6, %v1126_v5  ;;  %v2135_v10 = vpop.f32.mrb[56].mxu1 }
 0x5db   :  { %v2136_v63 = vpop.f32.mrb[57].mxu1 }
 0x5dc   :  { %v2137_v13 = vadd.f32 %v2136_v63, %v2135_v10  ;;  %v2138_v14 = vpop.f32.mrb[58].mxu1  ;;  %2300 = vmatmul.mubr.bf16.vlgmr.msra.gmra.mrb[64].mxu0 %v1197_v8 }
 0x5dd   :  { %v2139_v15 = vpop.f32.mrb[59].mxu1 }
 0x5de   :  { %v2140_v16 = vadd.f32 %v2139_v15, %v2138_v14  ;;  %v1134_v36 = vadd.f32 %v2137_v13, %v2876_v55 }
 0x5e0   :  { %v1137_v37 = vadd.f32 %v2140_v16, %v2876_v55 }
 0x5e2   :  { %v2141_v23 = vpop.f32.mrb[60].mxu1  ;;  %v1198_v17 = vpack.c.bf16 %v1137_v37, %v1134_v36 }
 0x5e3   :  { %v2142_v41 = vpop.f32.mrb[61].mxu1 }
 0x5e4   :  { %v2143_v42 = vadd.f32 %v2142_v41, %v2141_v23  ;;  %v2144_v18 = vpop.f32.mrb[62].mxu1  ;;  %2303 = vmatprep.mubr.bf16.mxu0 %v1198_v17 }
 0x5e5   :  { %v2145_v19 = vpop.f32.mrb[63].mxu1 }
 0x5e6   :  { %v2146_v43 = vadd.f32 %v2145_v19, %v2144_v18  ;;  %v1142_v44 = vadd.f32 %v2143_v42, %v2876_v55 }
 0x5e8   :  { %v1145_v21 = vadd.f32 %v2146_v43, %v2876_v55 }
 0x5ea   :  { %v2147_v45 = vpop.f32.mrb[64].mxu1  ;;  %v1199_v11 = vpack.c.bf16 %v1145_v21, %v1142_v44 }
 0x5eb   :  { %v2148_v48 = vpop.f32.mrb[65].mxu1 }
 0x5ec   :  { %v2149_v24 = vadd.f32 %v2148_v48, %v2147_v45  ;;  %v2150_v34 = vpop.f32.mrb[66].mxu1  ;;  %2304 = vmatmul.mubr.bf16.gmra.mrb[68].mxu0 %v1199_v11 }
 0x5ed   :  { %v2151_v25 = vpop.f32.mrb[67].mxu1 }
 0x5ee   :  { %v2152_v26 = vadd.f32 %v2151_v25, %v2150_v34  ;;  %v1150_v27 = vadd.f32 %v2149_v24, %v2876_v55 }
 0x5f0   :  { %v1153_v28 = vadd.f32 %v2152_v26, %v2876_v55 }
 0x5f2   :  { %v2153_v52 = vpop.f32.mrb[68].mxu1  ;;  %v1200_v29 = vpack.c.bf16 %v1153_v28, %v1150_v27 }
 0x5f3   :  { %v2154_v31 = vpop.f32.mrb[69].mxu1 }
 0x5f4   :  { %v2155_v12 = vadd.f32 %v2154_v31, %v2153_v52  ;;  %v2156_v32 = vpop.f32.mrb[70].mxu1  ;;  %2307 = vmatprep.mubr.bf16.mxu0 %v1200_v29 }
 0x5f5   :  { %v2157_v22 = vpop.f32.mrb[71].mxu1 }
 0x5f6   :  { %v2158_v33 = vadd.f32 %v2157_v22, %v2156_v32  ;;  %v1158_v35 = vadd.f32 %v2155_v12, %v2876_v55 }
 0x5f8   :  { %v1161_v38 = vadd.f32 %v2158_v33, %v2876_v55 }
 0x5fa   :  { %v1201_v39 = vpack.c.bf16 %v1161_v38, %v1158_v35  ;;  %v2159_v59 = vpop.f32.mrb[72].mxu1 }
 0x5fb   :  { %v2160_v40 = vpop.f32.mrb[73].mxu1 }
 0x5fc   :  { %2308 = vmatmul.mubr.bf16.gmra.mrb[72].mxu0 %v1201_v39  ;;  %v2161_v46 = vadd.f32 %v2160_v40, %v2159_v59  ;;  %v2162_v49 = vpop.f32.mrb[74].mxu1 }
 0x5fd   :  { %v2163_v50 = vpop.f32.mrb[75].mxu1 }
 0x5fe   :  { %v1166_v7 = vadd.f32 %v2161_v46, %v2876_v55  ;;  %v2164_v20 = vadd.f32 %v2163_v50, %v2162_v49  ;;  %v1646_v50 = vld [vmem:[%s3340_s5 + $0x8] sm:$0xff] }
 0x600   :  { %v1169_v51 = vadd.f32 %v2164_v20, %v2876_v55 }
 0x602   :  { %v2165_v30 = vpop.f32.mrb[76].mxu1  ;;  %v1202_v47 = vpack.c.bf16 %v1169_v51, %v1166_v7  ;;  %v1645_v7 = vld [vmem:[%s3340_s5] sm:$0xff] }
 0x603   :  { %v2166_v53 = vpop.f32.mrb[77].mxu1 }
 0x604   :  { %v2167_v54 = vadd.f32 %v2166_v53, %v2165_v30  ;;  %v2168_v9 = vpop.f32.mrb[78].mxu1  ;;  %2311 = vmatprep.mubr.bf16.mxu0 %v1202_v47 }
 0x605   :  { %v2169_v56 = vpop.f32.mrb[79].mxu1 }
 0x606   :  { %v1174_v57 = vadd.f32 %v2167_v54, %v2876_v55  ;;  %v2170_v58 = vadd.f32 %v2169_v56, %v2168_v9 }
 0x608   :  { %v1177_v60 = vadd.f32 %v2170_v58, %v2876_v55 }
 0x60a   :  { %v1203_v61 = vpack.c.bf16 %v1177_v60, %v1174_v57 }
 0x60c   :  { %2312 = vmatmul.mubr.bf16.gmra.mrb[76].mxu0 %v1203_v61 }
 0x6af   :  { %v2301_v3 = vpop.f32.mrb[64].mxu0 }
 0x6b0   :  { %v1300_v4 = vadd.f32 %v2301_v3, %v1922_v2  ;;  %v1291_v5 = vpop.f32.mrb[65].mxu0 }
 0x6b1   :  { %v1292_v6 = vadd.f32 %v1922_v2, %v1291_v5  ;;  %v2302_v8 = vpop.f32.mrb[66].mxu0 }
 0x6b2   :  { %v1303_v55 = vadd.f32 %v2302_v8, %v1922_v2  ;;  %v1294_v10 = vpop.f32.mrb[67].mxu0  ;;  %v2902_v63 = vsel %vm1356_vm0, %v1300_v4, -1e+30 }
 0x6b3   :  { %v1295_v13 = vadd.f32 %v1922_v2, %v1294_v10  ;;  %1377 = vmax.xlane.f32.xlu1 %v2902_v63  ;;  %v2907_v14 = vsel %vm1356_vm0, %v1292_v6, -1e+30 }
 0x6b4   :  { %1373 = vmax.xlane.f32.xlu0 %v2907_v14  ;;  %v2912_v15 = vsel %vm1356_vm0, %v1303_v55, -1e+30 }
 0x6b5   :  { %v2917_v16 = vsel %vm1356_vm0, %v1295_v13, -1e+30 }
 0x6b7   :  { %1379 = vmax.xlane.f32.xlu1 %v2912_v15 }
 0x6b8   :  { %1375 = vmax.xlane.f32.xlu0 %v2917_v16 }
 0x6bf   :  { %v2305_v36 = vpop.f32.mrb[68].mxu0 }
 0x6c0   :  { %v1307_v37 = vpop.f32.mrb[69].mxu0  ;;  %v1316_v18 = vadd.f32 %v2305_v36, %v1922_v2 }
 0x6c1   :  { %v1308_v23 = vadd.f32 %v1922_v2, %v1307_v37  ;;  %v2306_v17 = vpop.f32.mrb[70].mxu0 }
 0x6c2   :  { %v1319_v41 = vadd.f32 %v2306_v17, %v1922_v2  ;;  %v1310_v42 = vpop.f32.mrb[71].mxu0  ;;  %v2932_v21 = vsel %vm1356_vm0, %v1316_v18, -1e+30 }
 0x6c3   :  { %v2922_v19 = vsel %vm1356_vm0, %v1308_v23, -1e+30  ;;  %v1311_v43 = vadd.f32 %v1922_v2, %v1310_v42 }
 0x6c4   :  { %1381 = vmax.xlane.f32.xlu0 %v2922_v19  ;;  %v2927_v44 = vsel %vm1356_vm0, %v1319_v41, -1e+30 }
 0x6c5   :  { %1387 = vmax.xlane.f32.xlu1 %v2927_v44  ;;  %v2937_v45 = vsel %vm1356_vm0, %v1311_v43, -1e+30 }
 0x6c8   :  { %1385 = vmax.xlane.f32.xlu0 %v2932_v21 }
 0x6c9   :  { %1383 = vmax.xlane.f32.xlu1 %v2937_v45 }
 0x6cf   :  { %v2309_v11 = vpop.f32.mrb[72].mxu0 }
 0x6d0   :  { %v1323_v48 = vpop.f32.mrb[73].mxu0  ;;  %v1332_v27 = vadd.f32 %v2309_v11, %v1922_v2 }
 0x6d1   :  { %v1324_v24 = vadd.f32 %v1922_v2, %v1323_v48  ;;  %v2310_v34 = vpop.f32.mrb[74].mxu0 }
 0x6d2   :  { %v1335_v25 = vadd.f32 %v2310_v34, %v1922_v2  ;;  %v1326_v26 = vpop.f32.mrb[75].mxu0  ;;  %v2952_v31 = vsel %vm1356_vm0, %v1332_v27, -1e+30 }
 0x6d3   :  { %v2942_v28 = vsel %vm1356_vm0, %v1324_v24, -1e+30  ;;  %v1327_v52 = vadd.f32 %v1922_v2, %v1326_v26 }
 0x6d4   :  { %1389 = vmax.xlane.f32.xlu0 %v2942_v28  ;;  %v2947_v29 = vsel %vm1356_vm0, %v1335_v25, -1e+30 }
 0x6d5   :  { %1395 = vmax.xlane.f32.xlu1 %v2947_v29  ;;  %v2957_v12 = vsel %vm1356_vm0, %v1327_v52, -1e+30 }
 0x6d8   :  { %1393 = vmax.xlane.f32.xlu0 %v2952_v31 }
 0x6d9   :  { %1391 = vmax.xlane.f32.xlu1 %v2957_v12 }
 0x6df   :  { %v2313_v32 = vpop.f32.mrb[76].mxu0 }
 0x6e0   :  { %v1339_v22 = vpop.f32.mrb[77].mxu0  ;;  %v1348_v33 = vadd.f32 %v2313_v32, %v1922_v2 }
 0x6e1   :  { %v1340_v35 = vadd.f32 %v1922_v2, %v1339_v22  ;;  %v2314_v38 = vpop.f32.mrb[78].mxu0 }
 0x6e2   :  { %v1351_v39 = vadd.f32 %v2314_v38, %v1922_v2  ;;  %v1342_v59 = vpop.f32.mrb[79].mxu0  ;;  %v2967_v49 = vsel %vm1356_vm0, %v1348_v33, -1e+30 }
 0x6e3   :  { %v2962_v40 = vsel %vm1356_vm0, %v1340_v35, -1e+30  ;;  %v1343_v46 = vadd.f32 %v1922_v2, %v1342_v59  ;;  %v1648_v59 = vld [vmem:[%s3340_s5 + $0x18] sm:$0xff] }
 0x6e4   :  { %1397 = vmax.xlane.f32.xlu0 %v2962_v40  ;;  %v2978_v20 = vsel %vm1356_vm0, %v1351_v39, -1e+30 }
 0x6e5   :  { %v2983_v51 = vsel %vm1356_vm0, %v1343_v46, -1e+30  ;;  %v1650_v46 = vld [vmem:[%s3340_s5 + $0x28] sm:$0xff] }
 0x6e8   :  { %1401 = vmax.xlane.f32.xlu0 %v2967_v49 }
 0x6ea   :  { %1665 = vperm.xlu1 %2323, %v1646_v50   ;;  %v1652_v50 = vld [vmem:[%s3340_s5 + $0x38] sm:$0xff] }
 0x6fe   :  { %1662 = vperm.xlu0 %2322, %v1645_v7   ;;  %v1653_v7 = vld [vmem:[%s3340_s5 + $0x40] sm:$0xff] }
 0x70e   :  { %1403 = vmax.xlane.f32.xlu1 %v2978_v20 }
 0x712   :  { %1399 = vmax.xlane.f32.xlu1 %v2983_v51 }
 0x740   :  { %v1378_v30 = vpop.xlane.xlu1 %1377 }
 0x741   :  { %v1407_v47 = vsub.f32 %v2902_v63, %v1378_v30  ;;  %v1374_v53 = vpop.xlane.xlu0 %1373  ;;  %v1655_v30 = vld [vmem:[%s3340_s5 + $0x50] sm:$0xff] }
 0x742   :  { %v1405_v54 = vsub.f32 %v2907_v14, %v1374_v53  ;;  %v1649_v53 = vld [vmem:[%s3340_s5 + $0x20] sm:$0xff] }
 0x743   :  { %v1425_v9 = vmul.f32 1.442695, %v1407_v47  ;;  %v1647_v47 = vld [vmem:[%s3340_s5 + $0x10] sm:$0xff] }
 0x744   :  { %v1421_v56 = vmul.f32 1.442695, %v1405_v54  ;;  %v1380_v57 = vpop.xlane.xlu1 %1379 }
 0x745   :  { %2388 = vpow2.f32 %v1425_v9  ;;  %v1408_v58 = vsub.f32 %v2912_v15, %v1380_v57  ;;  %v1376_v60 = vpop.xlane.xlu0 %1375  ;;  %v1654_v9 = vld [vmem:[%s3340_s5 + $0x48] sm:$0xff] }
 0x746   :  { %v1406_v61 = vsub.f32 %v2917_v16, %v1376_v60  ;;  %2390 = vpow2.f32 %v1421_v56 }
 0x747   :  { %v1427_v62 = vmul.f32 1.442695, %v1408_v58 }
 0x748   :  { %v1423_v0 = vmul.f32 1.442695, %v1406_v61 }
 0x749   :  { %2392 = vpow2.f32 %v1427_v62 }
 0x74a   :  { %2394 = vpow2.f32 %v1423_v0 }
 0x74f   :  { %v2990_v2 = vpop.eup %2388 }
 0x750   :  { %1457 = vadd.xlane.f32.xlu0 %v2990_v2  ;;  %v2993_v4 = vpop.eup %2390 }
 0x751   :  { %v1382_v3 = vpop.xlane.xlu0 %1381 }
 0x752   :  { %v1388_v5 = vpop.xlane.xlu1 %1387  ;;  %v1409_v63 = vsub.f32 %v2922_v19, %v1382_v3 }
 0x753   :  { %v2995_v6 = vpop.eup %2392  ;;  %v1412_v8 = vsub.f32 %v2927_v44, %v1388_v5  ;;  %v1656_v5 = vld [vmem:[%s3340_s5 + $0x58] sm:$0xff] }
 0x754   :  { %1459 = vadd.xlane.f32.xlu1 %v2995_v6  ;;  %1453 = vadd.xlane.f32.xlu0 %v2993_v4  ;;  %v3002_v15 = vpop.eup %2394  ;;  %v1429_v23 = vmul.f32 1.442695, %v1409_v63 }
 0x755   :  { %v1435_v55 = vmul.f32 1.442695, %v1412_v8  ;;  %v1386_v10 = vpop.xlane.xlu0 %1385  ;;  %v1658_v8 = vld [vmem:[%s3340_s5 + $0x68] sm:$0xff] }
 0x756   :  { %v1411_v13 = vsub.f32 %v2932_v21, %v1386_v10  ;;  %v1384_v14 = vpop.xlane.xlu1 %1383 }
 0x757   :  { %2396 = vpow2.f32 %v1435_v55  ;;  %v1410_v16 = vsub.f32 %v2937_v45, %v1384_v14 }
 0x758   :  { %v1433_v36 = vmul.f32 1.442695, %v1411_v13  ;;  %1455 = vadd.xlane.f32.xlu1 %v3002_v15 }
 0x759   :  { %v1431_v37 = vmul.f32 1.442695, %v1410_v16 }
 0x75a   :  { %2398 = vpow2.f32 %v1433_v36 }
 0x75b   :  { %2400 = vpow2.f32 %v1431_v37 }
 0x75c   :  { %2402 = vpow2.f32 %v1429_v23 }
 0x761   :  { %v3006_v17 = vpop.eup %2396  ;;  %v1390_v41 = vpop.xlane.xlu0 %1389 }
 0x762   :  { %v1396_v42 = vpop.xlane.xlu1 %1395  ;;  %1467 = vadd.xlane.f32.xlu1 %v3006_v17  ;;  %v1413_v45 = vsub.f32 %v2942_v28, %v1390_v41 }
 0x763   :  { %v1416_v18 = vsub.f32 %v2947_v29, %v1396_v42 }
 0x764   :  { %v3010_v19 = vpop.eup %2398  ;;  %v1437_v27 = vmul.f32 1.442695, %v1413_v45 }
 0x765   :  { %v3012_v43 = vpop.eup %2400  ;;  %v1443_v44 = vmul.f32 1.442695, %v1416_v18  ;;  %v1394_v21 = vpop.xlane.xlu0 %1393  ;;  %1465 = vadd.xlane.f32.xlu0 %v3010_v19 }
 0x766   :  { %v1415_v11 = vsub.f32 %v2952_v31, %v1394_v21  ;;  %v1392_v48 = vpop.xlane.xlu1 %1391  ;;  %1463 = vadd.xlane.f32.xlu1 %v3012_v43  ;;  %v3019_v34 = vpop.eup %2402 }
 0x767   :  { %2404 = vpow2.f32 %v1443_v44  ;;  %v1414_v24 = vsub.f32 %v2957_v12, %v1392_v48 }
 0x768   :  { %v1441_v25 = vmul.f32 1.442695, %v1415_v11 }
 0x769   :  { %v1439_v26 = vmul.f32 1.442695, %v1414_v24  ;;  %1461 = vadd.xlane.f32.xlu0 %v3019_v34 }
 0x76a   :  { %2406 = vpow2.f32 %v1441_v25  ;;  %v3066_v54 = vpop.permute.xlu1 %1665 }
 0x76b   :  { %2408 = vpow2.f32 %v1439_v26  ;;  %vm1710_vm3 = vcmp.eq.s32.totalorder %v2894_v1, %v3066_v54 }
 0x76c   :  { %2410 = vpow2.f32 %v1437_v27 }
 0x771   :  { %v3022_v52 = vpop.eup %2404  ;;  %v1398_v28 = vpop.xlane.xlu0 %1397 }
 0x772   :  { %1475 = vadd.xlane.f32.xlu1 %v3022_v52  ;;  %v1417_v32 = vsub.f32 %v2962_v40, %v1398_v28 }
 0x774   :  { %v3025_v29 = vpop.eup %2406  ;;  %v1445_v38 = vmul.f32 1.442695, %v1417_v32 }
 0x775   :  { %v3027_v31 = vpop.eup %2408  ;;  %1473 = vadd.xlane.f32.xlu0 %v3025_v29  ;;  %v1402_v12 = vpop.xlane.xlu0 %1401 }
 0x776   :  { %v1419_v22 = vsub.f32 %v2967_v49, %v1402_v12  ;;  %1471 = vadd.xlane.f32.xlu1 %v3027_v31  ;;  %v3033_v33 = vpop.eup %2410  ;;  %v1651_v49 = vld [vmem:[%s3340_s5 + $0x30] sm:$0xff] }
 0x778   :  { %v1449_v35 = vmul.f32 1.442695, %v1419_v22 }
 0x779   :  { %1469 = vadd.xlane.f32.xlu0 %v3033_v33 }
 0x77a   :  { %2412 = vpow2.f32 %v1449_v35 }
 0x77b   :  { %2414 = vpow2.f32 %v1445_v38 }
 0x784   :  { %v3036_v39 = vpop.eup %2412 }
 0x785   :  { %1481 = vadd.xlane.f32.xlu0 %v3036_v39  ;;  %v3042_v40 = vpop.eup %2414 }
 0x787   :  { %1671 = vperm.xlu1 %2323, %v1648_v59  }
 0x789   :  { %1477 = vadd.xlane.f32.xlu0 %v3042_v40 }
 0x78b   :  { %1677 = vperm.xlu1 %2323, %v1650_v46  }
 0x78f   :  { %1680 = vperm.xlu1 %2323, %v1651_v49  }
 0x793   :  { %1683 = vperm.xlu1 %2323, %v1652_v50  }
 0x797   :  { %1686 = vperm.xlu1 %2323, %v1653_v7  }
 0x79b   :  { %1692 = vperm.xlu1 %2323, %v1655_v30   ;;  %v1404_v56 = vpop.xlane.xlu1 %1403 }
 0x79c   :  { %v1420_v57 = vsub.f32 %v2978_v20, %v1404_v56  ;;  %v1657_v20 = vld [vmem:[%s3340_s5 + $0x60] sm:$0xff] }
 0x79e   :  { %v1451_v60 = vmul.f32 1.442695, %v1420_v57 }
 0x79f   :  { %1668 = vperm.xlu0 %2322, %v1647_v47   ;;  %v1400_v58 = vpop.xlane.xlu1 %1399 }
 0x7a0   :  { %v1418_v61 = vsub.f32 %v2983_v51, %v1400_v58  ;;  %2416 = vpow2.f32 %v1451_v60  ;;  %v3085_v51 = vpop.permute.xlu0 %1662 }
 0x7a1   :  { %vm1709_vm1 = vcmp.eq.s32.totalorder %v2894_v1, %v3085_v51 }
 0x7a2   :  { %v1447_v62 = vmul.f32 1.442695, %v1418_v61 }
 0x7a3   :  { %1674 = vperm.xlu0 %2322, %v1649_v53  }
 0x7a4   :  { %2418 = vpow2.f32 %v1447_v62 }
 0x7a7   :  { %1689 = vperm.xlu0 %2322, %v1654_v9  }
 0x7aa   :  { %v3073_v0 = vpop.eup %2416 }
 0x7ae   :  { %v3076_v3 = vpop.eup %2418 }
 0x7bf   :  { %1483 = vadd.xlane.f32.xlu1 %v3073_v0 }
 0x7c3   :  { %1479 = vadd.xlane.f32.xlu1 %v3076_v3 }
 0x7d4   :  { %1695 = vperm.xlu1 %2323, %v1656_v5  }
 0x7d8   :  { %1698 = vperm.xlu1 %2323, %v1657_v20  }
 0x7dc   :  { %1701 = vperm.xlu1 %2323, %v1658_v8  }
 0x7dd   :  { %v1458_v55 = vpop.xlane.xlu0 %1457 }
 0x7de   :  { %2420 = vrcp.f32 %v1458_v55 }
 0x7e1   :  { %v1460_v10 = vpop.xlane.xlu1 %1459  ;;  %v1454_v63 = vpop.xlane.xlu0 %1453 }
 0x7e2   :  { %2422 = vrcp.f32 %v1460_v10 }
 0x7e3   :  { %2424 = vrcp.f32 %v1454_v63 }
 0x7e5   :  { %v1456_v13 = vpop.xlane.xlu1 %1455 }
 0x7e6   :  { %2426 = vrcp.f32 %v1456_v13 }
 0x7e8   :  { %v2421_v14 = vpop.eup %2420 }
 0x7e9   :  { %v3091_v16 = vmul.f32 %v2421_v14, %v2990_v2 }
 0x7eb   :  { %v1521_v36 = vmul.f32 1.442695, %v3091_v16 }
 0x7ec   :  { %v2423_v37 = vpop.eup %2422 }
 0x7ed   :  { %v2425_v23 = vpop.eup %2424  ;;  %v3095_v41 = vmul.f32 %v2423_v37, %v2995_v6  ;;  %2428 = vpow2.f32 %v1521_v36 }
 0x7ee   :  { %v3098_v42 = vmul.f32 %v2425_v23, %v2993_v4 }
 0x7ef   :  { %v1468_v18 = vpop.xlane.xlu1 %1467  ;;  %v1523_v44 = vmul.f32 1.442695, %v3095_v41 }
 0x7f0   :  { %v2427_v21 = vpop.eup %2426  ;;  %2430 = vrcp.f32 %v1468_v18  ;;  %v1517_v45 = vmul.f32 1.442695, %v3098_v42 }
 0x7f1   :  { %v3103_v2 = vmul.f32 %v2427_v21, %v3002_v15  ;;  %2432 = vpow2.f32 %v1523_v44 }
 0x7f2   :  { %v1466_v11 = vpop.xlane.xlu0 %1465  ;;  %2434 = vpow2.f32 %v1517_v45 }
 0x7f3   :  { %2436 = vrcp.f32 %v1466_v11  ;;  %v1464_v6 = vpop.xlane.xlu1 %1463  ;;  %v1519_v48 = vmul.f32 1.442695, %v3103_v2 }
 0x7f4   :  { %2438 = vrcp.f32 %v1464_v6 }
 0x7f5   :  { %2440 = vpow2.f32 %v1519_v48 }
 0x7f6   :  { %v1462_v4 = vpop.xlane.xlu0 %1461 }
 0x7f7   :  { %v2429_v24 = vpop.eup %2428  ;;  %2442 = vrcp.f32 %v1462_v4 }
 0x7f8   :  { %v1551_v25 = vsel %vm1356_vm0, %v2429_v24, 0.0 }
 0x7f9   :  { %1569 = vadd.xlane.f32.xlu0 %v1551_v25 }
 0x7fa   :  { %v2431_v26 = vpop.eup %2430 }
 0x7fb   :  { %v2433_v27 = vpop.eup %2432  ;;  %v3109_v15 = vmul.f32 %v2431_v26, %v3006_v17 }
 0x7fc   :  { %v2435_v28 = vpop.eup %2434  ;;  %v1552_v17 = vsel %vm1356_vm0, %v2433_v27, 0.0 }
 0x7fd   :  { %v2437_v12 = vpop.eup %2436  ;;  %v1549_v32 = vsel %vm1356_vm0, %v2435_v28, 0.0  ;;  %v1531_v22 = vmul.f32 1.442695, %v3109_v15 }
 0x7fe   :  { %v2439_v35 = vpop.eup %2438  ;;  %v3115_v38 = vmul.f32 %v2437_v12, %v3010_v19  ;;  %1565 = vadd.xlane.f32.xlu0 %v1549_v32 }
 0x7ff   :  { %v3118_v59 = vmul.f32 %v2439_v35, %v3012_v43  ;;  %v1476_v46 = vpop.xlane.xlu1 %1475  ;;  %2444 = vpow2.f32 %v1531_v22  ;;  %v2441_v49 = vpop.eup %2440 }
 0x800   :  { %2446 = vrcp.f32 %v1476_v46  ;;  %1571 = vadd.xlane.f32.xlu1 %v1552_v17  ;;  %v1529_v50 = vmul.f32 1.442695, %v3115_v38  ;;  %v1550_v53 = vsel %vm1356_vm0, %v2441_v49, 0.0 }
 0x801   :  { %v2443_v7 = vpop.eup %2442  ;;  %v1527_v30 = vmul.f32 1.442695, %v3118_v59 }
 0x802   :  { %v3125_v19 = vmul.f32 %v2443_v7, %v3019_v34  ;;  %v1474_v47 = vpop.xlane.xlu0 %1473  ;;  %2448 = vpow2.f32 %v1529_v50  ;;  %v1659_v7 = vld [vmem:[%s3340_s5 + $0x70] sm:$0xff] }
 0x803   :  { %2450 = vrcp.f32 %v1474_v47  ;;  %v1472_v43 = vpop.xlane.xlu1 %1471 }
 0x804   :  { %2452 = vrcp.f32 %v1472_v43  ;;  %1567 = vadd.xlane.f32.xlu1 %v1550_v53  ;;  %v1525_v9 = vmul.f32 1.442695, %v3125_v19 }
 0x805   :  { %2454 = vpow2.f32 %v1527_v30 }
 0x806   :  { %v1470_v56 = vpop.xlane.xlu0 %1469  ;;  %2456 = vpow2.f32 %v1525_v9 }
 0x807   :  { %2458 = vrcp.f32 %v1470_v56  ;;  %v3170_v32 = vpop.permute.xlu1 %1671 }
 0x808   :  { %vm1712_vm2 = vcmp.eq.s32.totalorder %v2894_v1, %v3170_v32 }
 0x809   :  { %v2445_v57 = vpop.eup %2444 }
 0x80a   :  { %v2447_v58 = vpop.eup %2446  ;;  %v1556_v34 = vsel %vm1356_vm0, %v2445_v57, 0.0 }
 0x80b   :  { %v3133_v60 = vmul.f32 %v2447_v58, %v3022_v52  ;;  %1579 = vadd.xlane.f32.xlu1 %v1556_v34  ;;  %v3174_v17 = vpop.permute.xlu1 %1677 }
 0x80c   :  { %v2449_v61 = vpop.eup %2448  ;;  %vm1714_vm5 = vcmp.eq.s32.totalorder %v2894_v1, %v3174_v17 }
 0x80d   :  { %v2451_v62 = vpop.eup %2450  ;;  %v1555_v5 = vsel %vm1356_vm0, %v2449_v61, 0.0  ;;  %v1539_v20 = vmul.f32 1.442695, %v3133_v60 }
 0x80e   :  { %v2453_v8 = vpop.eup %2452  ;;  %v3139_v55 = vmul.f32 %v2451_v62, %v3025_v29  ;;  %1577 = vadd.xlane.f32.xlu0 %v1555_v5 }
 0x80f   :  { %v2455_v10 = vpop.eup %2454  ;;  %v3142_v63 = vmul.f32 %v2453_v8, %v3027_v31  ;;  %2460 = vpow2.f32 %v1539_v20 }
 0x810   :  { %v2457_v52 = vpop.eup %2456  ;;  %v1554_v13 = vsel %vm1356_vm0, %v2455_v10, 0.0  ;;  %v1537_v14 = vmul.f32 1.442695, %v3139_v55 }
 0x811   :  { %v2459_v36 = vpop.eup %2458  ;;  %1575 = vadd.xlane.f32.xlu1 %v1554_v13  ;;  %v1553_v37 = vsel %vm1356_vm0, %v2457_v52, 0.0  ;;  %v1535_v29 = vmul.f32 1.442695, %v3142_v63 }
 0x812   :  { %v3151_v23 = vmul.f32 %v2459_v36, %v3033_v33  ;;  %1573 = vadd.xlane.f32.xlu0 %v1553_v37  ;;  %v1482_v31 = vpop.xlane.xlu0 %1481  ;;  %2462 = vpow2.f32 %v1537_v14 }
 0x813   :  { %2464 = vrcp.f32 %v1482_v31 }
 0x814   :  { %2466 = vpow2.f32 %v1535_v29  ;;  %v1533_v18 = vmul.f32 1.442695, %v3151_v23 }
 0x816   :  { %v1478_v44 = vpop.xlane.xlu0 %1477  ;;  %2468 = vpow2.f32 %v1533_v18 }
 0x817   :  { %2470 = vrcp.f32 %v1478_v44 }
 0x819   :  { %v2461_v21 = vpop.eup %2460 }
 0x81a   :  { %v1560_v45 = vsel %vm1356_vm0, %v2461_v21, 0.0 }
 0x81b   :  { %1587 = vadd.xlane.f32.xlu1 %v1560_v45 }
 0x81c   :  { %v2463_v11 = vpop.eup %2462 }
 0x81d   :  { %v2465_v6 = vpop.eup %2464  ;;  %v1559_v33 = vsel %vm1356_vm0, %v2463_v11, 0.0 }
 0x81e   :  { %v2467_v48 = vpop.eup %2466  ;;  %v3159_v4 = vmul.f32 %v2465_v6, %v3036_v39  ;;  %1585 = vadd.xlane.f32.xlu0 %v1559_v33  ;;  %v1669_v8 = vpop.permute.xlu0 %1668 }
 0x81f   :  { %v1558_v24 = vsel %vm1356_vm0, %v2467_v48, 0.0  ;;  %vm1711_vm4 = vcmp.eq.s32.totalorder %v2894_v1, %v1669_v8 }
 0x820   :  { %v2469_v25 = vpop.eup %2468  ;;  %1583 = vadd.xlane.f32.xlu1 %v1558_v24  ;;  %v1545_v26 = vmul.f32 1.442695, %v3159_v4 }
 0x821   :  { %v2471_v27 = vpop.eup %2470  ;;  %v1557_v28 = vsel %vm1356_vm0, %v2469_v25, 0.0 }
 0x822   :  { %v3167_v12 = vmul.f32 %v2471_v27, %v3042_v40  ;;  %1581 = vadd.xlane.f32.xlu0 %v1557_v28  ;;  %2472 = vpow2.f32 %v1545_v26  ;;  %v3178_v40 = vpop.permute.xlu1 %1680  ;;  %v3201_v10 = vpop.permute.xlu0 %1674 }
 0x823   :  { %vm1713_vm6 = vcmp.eq.s32.totalorder %v2894_v1, %v3201_v10  ;;  %vm1715_vm8 = vcmp.eq.s32.totalorder %v2894_v1, %v3178_v40 }
 0x824   :  { %v1541_v39 = vmul.f32 1.442695, %v3167_v12 }
 0x826   :  { %2474 = vpow2.f32 %v1541_v39  ;;  %v3180_v50 = vpop.permute.xlu1 %1683  ;;  %v3208_v13 = vpop.permute.xlu0 %1689 }
 0x827   :  { %vm1716_vm7 = vcmp.eq.s32.totalorder %v2894_v1, %v3180_v50  ;;  %vm1718_vm9 = vcmp.eq.s32.totalorder %v2894_v1, %v3208_v13 }
 0x82a   :  { %v3185_v30 = vpop.permute.xlu1 %1686 }
 0x82b   :  { %vm1717_vm10 = vcmp.eq.s32.totalorder %v2894_v1, %v3185_v30 }
 0x82c   :  { %v2473_v22 = vpop.eup %2472 }
 0x82d   :  { %v1563_v35 = vsel %vm1356_vm0, %v2473_v22, 0.0 }
 0x82e   :  { %1593 = vadd.xlane.f32.xlu1 %v1563_v35  ;;  %v3187_v47 = vpop.permute.xlu1 %1692 }
 0x82f   :  { %vm1719_vm12 = vcmp.eq.s32.totalorder %v2894_v1, %v3187_v47 }
 0x830   :  { %v2475_v46 = vpop.eup %2474 }
 0x831   :  { %v1561_v49 = vsel %vm1356_vm0, %v2475_v46, 0.0 }
 0x832   :  { %1589 = vadd.xlane.f32.xlu1 %v1561_v49 }
 0x843   :  { %1704 = vperm.xlu1 %2323, %v1659_v7  }
 0x84c   :  { %v1484_v43 = vpop.xlane.xlu1 %1483 }
 0x84d   :  { %2476 = vrcp.f32 %v1484_v43 }
 0x850   :  { %v1480_v53 = vpop.xlane.xlu1 %1479 }
 0x851   :  { %2478 = vrcp.f32 %v1480_v53 }
 0x854   :  { %v3203_v52 = vpop.permute.xlu1 %1695 }
 0x855   :  { %vm1720_vm11 = vcmp.eq.s32.totalorder %v2894_v1, %v3203_v52 }
 0x857   :  { %v2477_v9 = vpop.eup %2476 }
 0x858   :  { %v3190_v56 = vmul.f32 %v2477_v9, %v3073_v0  ;;  %v3210_v14 = vpop.permute.xlu1 %1698 }
 0x859   :  { %vm1721_vm13 = vcmp.eq.s32.totalorder %v2894_v1, %v3210_v14 }
 0x85a   :  { %v1547_v57 = vmul.f32 1.442695, %v3190_v56 }
 0x85b   :  { %v2479_v58 = vpop.eup %2478 }
 0x85c   :  { %v3194_v34 = vmul.f32 %v2479_v58, %v3076_v3  ;;  %2480 = vpow2.f32 %v1547_v57  ;;  %v1660_v3 = vld [vmem:[%s3340_s5 + $0x78] sm:$0xff]  ;;  %v3212_v37 = vpop.permute.xlu1 %1701 }
 0x85d   :  { %vm1722_vm15 = vcmp.eq.s32.totalorder %v2894_v1, %v3212_v37  ;;  %v1775_v37 = vld [vmem:[%s3339_s4 + $0x10] sm:$0xff] }
 0x85e   :  { %v1543_v61 = vmul.f32 1.442695, %v3194_v34 }
 0x860   :  { %2482 = vpow2.f32 %v1543_v61 }
 0x866   :  { %v2481_v62 = vpop.eup %2480 }
 0x867   :  { %v1564_v5 = vsel %vm1356_vm0, %v2481_v62, 0.0 }
 0x868   :  { %1595 = vadd.xlane.f32.xlu0 %v1564_v5 }
 0x86a   :  { %v2483_v20 = vpop.eup %2482 }
 0x86b   :  { %v1562_v0 = vsel %vm1356_vm0, %v2483_v20, 0.0 }
 0x86c   :  { %1591 = vadd.xlane.f32.xlu0 %v1562_v0 }
 0x882   :  { %1707 = vperm.xlu0 %2322, %v1660_v3  }
 0x886   :  { %v1570_v36 = vpop.xlane.xlu0 %1569 }
 0x88b   :  { %v1566_v29 = vpop.xlane.xlu0 %1565 }
 0x88c   :  { %2484 = vlog2.f32 %v1566_v29 }
 0x88d   :  { %v1572_v31 = vpop.xlane.xlu1 %1571 }
 0x88e   :  { %2486 = vlog2.f32 %v1572_v31 }
 0x88f   :  { %2488 = vlog2.f32 %v1570_v36 }
 0x891   :  { %v1568_v18 = vpop.xlane.xlu1 %1567 }
 0x892   :  { %2490 = vlog2.f32 %v1568_v18 }
 0x896   :  { %v2485_v44 = vpop.eup %2484 }
 0x897   :  { %v1598_v21 = vmul.f32 0.6931472, %v2485_v44 }
 0x898   :  { %v2487_v45 = vpop.eup %2486  ;;  %v1580_v11 = vpop.xlane.xlu1 %1579 }
 0x899   :  { %v1604_v6 = vmul.f32 0.6931472, %v2487_v45  ;;  %v1629_v33 = vsub.f32 %v3098_v42, %v1598_v21  ;;  %v2489_v48 = vpop.eup %2488  ;;  %2492 = vlog2.f32 %v1580_v11 }
 0x89a   :  { %v1602_v28 = vmul.f32 0.6931472, %v2489_v48 }
 0x89b   :  { %v1725_v24 = vsel %vm1709_vm1, %v1629_v33, 0.0  ;;  %v1578_v25 = vpop.xlane.xlu0 %1577  ;;  %v1632_v26 = vsub.f32 %v3095_v41, %v1604_v6  ;;  %vm1805_vm1 = vcmask 7168  }
 0x89c   :  { %v2491_v27 = vpop.eup %2490  ;;  %1741 = vadd.xlane.f32.xlu1 %v1725_v24  ;;  %2494 = vlog2.f32 %v1578_v25  ;;  %v1631_v41 = vsub.f32 %v3091_v16, %v1602_v28 }
 0x89d   :  { %v1600_v39 = vmul.f32 0.6931472, %v2491_v27  ;;  %v1728_v22 = vsel %vm1712_vm2, %v1632_v26, 0.0 }
 0x89e   :  { %v1576_v35 = vpop.xlane.xlu1 %1575  ;;  %v1727_v32 = vsel %vm1711_vm4, %v1631_v41, 0.0 }
 0x89f   :  { %2496 = vlog2.f32 %v1576_v35  ;;  %v1574_v42 = vpop.xlane.xlu0 %1573  ;;  %v1630_v46 = vsub.f32 %v3103_v2, %v1600_v39 }
 0x8a0   :  { %1747 = vadd.xlane.f32.xlu1 %v1728_v22  ;;  %2498 = vlog2.f32 %v1574_v42 }
 0x8a1   :  { %v1726_v51 = vsel %vm1710_vm3, %v1630_v46, 0.0 }
 0x8a2   :  { %1743 = vadd.xlane.f32.xlu0 %v1726_v51 }
 0x8a3   :  { %v2493_v49 = vpop.eup %2492 }
 0x8a4   :  { %v1612_v57 = vmul.f32 0.6931472, %v2493_v49 }
 0x8a6   :  { %1745 = vadd.xlane.f32.xlu0 %v1727_v32  ;;  %v2495_v7 = vpop.eup %2494  ;;  %v1636_v0 = vsub.f32 %v3109_v15, %v1612_v57  ;;  %v1774_v32 = vld [vmem:[%s3339_s4 + $0x8] sm:$0xff] }
 0x8a7   :  { %v1610_v58 = vmul.f32 0.6931472, %v2495_v7 }
 0x8a8   :  { %v1588_v43 = vpop.xlane.xlu1 %1587 }
 0x8a9   :  { %v2497_v53 = vpop.eup %2496  ;;  %2500 = vlog2.f32 %v1588_v43  ;;  %v1635_v36 = vsub.f32 %v3115_v38, %v1610_v58 }
 0x8aa   :  { %v2499_v9 = vpop.eup %2498  ;;  %v1608_v2 = vmul.f32 0.6931472, %v2497_v53 }
 0x8ab   :  { %v1606_v61 = vmul.f32 0.6931472, %v2499_v9  ;;  %v1586_v54 = vpop.xlane.xlu0 %1585  ;;  %v1776_v9 = vld [vmem:[%s3339_s4 + $0x18] sm:$0xff] }
 0x8ac   :  { %v1634_v62 = vsub.f32 %v3118_v59, %v1608_v2  ;;  %2502 = vlog2.f32 %v1586_v54  ;;  %v1732_v59 = vsel %vm1716_vm7, %v1636_v0, 0.0  ;;  %v1777_v2 = vld [vmem:[%s3339_s4 + $0x20] sm:$0xff]  ;;  %v1778_v0 = vld [vmem:[%s3339_s4 + $0x28] sm:$0xff] }
 0x8ad   :  { %v1584_v16 = vpop.xlane.xlu1 %1583  ;;  %v1633_v5 = vsub.f32 %v3125_v19, %v1606_v61  ;;  %v1731_v19 = vsel %vm1715_vm8, %v1635_v36, 0.0 }
 0x8ae   :  { %2504 = vlog2.f32 %v1584_v16  ;;  %v1730_v20 = vsel %vm1714_vm5, %v1634_v62, 0.0 }
 0x8af   :  { %1751 = vadd.xlane.f32.xlu1 %v1730_v20  ;;  %v1582_v8 = vpop.xlane.xlu0 %1581  ;;  %v1729_v3 = vsel %vm1713_vm6, %v1633_v5, 0.0 }
 0x8b0   :  { %2506 = vlog2.f32 %v1582_v8  ;;  %1749 = vadd.xlane.f32.xlu0 %v1729_v3 }
 0x8b3   :  { %1755 = vadd.xlane.f32.xlu1 %v1732_v59  ;;  %v2501_v17 = vpop.eup %2500 }
 0x8b4   :  { %1753 = vadd.xlane.f32.xlu0 %v1731_v19  ;;  %v1620_v29 = vmul.f32 0.6931472, %v2501_v17  ;;  %v1779_v19 = vld [vmem:[%s3339_s4 + $0x30] sm:$0xff] }
 0x8b6   :  { %v2503_v10 = vpop.eup %2502  ;;  %v1640_v11 = vsub.f32 %v3133_v60, %v1620_v29 }
 0x8b7   :  { %v1618_v44 = vmul.f32 0.6931472, %v2503_v10 }
 0x8b8   :  { %v2505_v15 = vpop.eup %2504 }
 0x8b9   :  { %v1616_v31 = vmul.f32 0.6931472, %v2505_v15  ;;  %v1639_v48 = vsub.f32 %v3139_v55, %v1618_v44 }
 0x8ba   :  { %v2507_v18 = vpop.eup %2506 }
 0x8bb   :  { %v1614_v38 = vmul.f32 0.6931472, %v2507_v18  ;;  %v1594_v21 = vpop.xlane.xlu1 %1593  ;;  %v1638_v45 = vsub.f32 %v3142_v63, %v1616_v31  ;;  %v1736_v63 = vsel %vm1720_vm11, %v1640_v11, 0.0  ;;  %v1735_v60 = vsel %vm1719_vm12, %v1639_v48, 0.0  ;;  %v1780_v18 = vld [vmem:[%s3339_s4 + $0x38] sm:$0xff] }
 0x8bc   :  { %2508 = vlog2.f32 %v1594_v21  ;;  %v1781_v21 = vld [vmem:[%s3339_s4 + $0x40] sm:$0xff] }
 0x8bd   :  { %v1734_v50 = vsel %vm1718_vm9, %v1638_v45, 0.0  ;;  %v1637_v40 = vsub.f32 %v3151_v23, %v1614_v38 }
 0x8be   :  { %1759 = vadd.xlane.f32.xlu1 %v1734_v50 }
 0x8bf   :  { %v1590_v6 = vpop.xlane.xlu1 %1589  ;;  %v1733_v33 = vsel %vm1717_vm10, %v1637_v40, 0.0 }
 0x8c0   :  { %2510 = vlog2.f32 %v1590_v6  ;;  %1757 = vadd.xlane.f32.xlu0 %v1733_v33  ;;  %v1782_v33 = vld [vmem:[%s3339_s4 + $0x48] sm:$0xff] }
 0x8c2   :  { %1763 = vadd.xlane.f32.xlu1 %v1736_v63 }
 0x8c3   :  { %v1705_v55 = vpop.permute.xlu1 %1704 }
 0x8c4   :  { %1761 = vadd.xlane.f32.xlu0 %v1735_v60  ;;  %vm1723_vm14 = vcmp.eq.s32.totalorder %v2894_v1, %v1705_v55 }
 0x8c6   :  { %v2509_v23 = vpop.eup %2508 }
 0x8c7   :  { %v1626_v13 = vmul.f32 0.6931472, %v2509_v23 }
 0x8c9   :  { %v1643_v26 = vsub.f32 %v3159_v4, %v1626_v13 }
 0x8ca   :  { %v2511_v30 = vpop.eup %2510 }
 0x8cb   :  { %v1622_v24 = vmul.f32 0.6931472, %v2511_v30  ;;  %v1739_v47 = vsel %vm1723_vm14, %v1643_v26, 0.0  ;;  %v1783_v30 = vld [vmem:[%s3339_s4 + $0x50] sm:$0xff]  ;;  %v1784_v26 = vld [vmem:[%s3339_s4 + $0x58] sm:$0xff] }
 0x8cd   :  { %v1641_v25 = vsub.f32 %v3167_v12, %v1622_v24 }
 0x8cf   :  { %v1737_v52 = vsel %vm1721_vm13, %v1641_v25, 0.0 }
 0x8d0   :  { %1765 = vadd.xlane.f32.xlu0 %v1737_v52 }
 0x8d4   :  { %1769 = vadd.xlane.f32.xlu0 %v1739_v47 }
 0x8f5   :  { %v1596_v27 = vpop.xlane.xlu0 %1595 }
 0x8f6   :  { %2512 = vlog2.f32 %v1596_v27 }
 0x8f9   :  { %v1592_v28 = vpop.xlane.xlu0 %1591 }
 0x8fa   :  { %2514 = vlog2.f32 %v1592_v28  ;;  %v1785_v28 = vld [vmem:[%s3339_s4 + $0x60] sm:$0xff] }
 0x900   :  { %v2513_v39 = vpop.eup %2512 }
 0x901   :  { %v1628_v35 = vmul.f32 0.6931472, %v2513_v39  ;;  %v1708_v14 = vpop.permute.xlu0 %1707 }
 0x902   :  { %vm1724_vm0 = vcmp.eq.s32.totalorder %v2894_v1, %v1708_v14  ;;  %v1787_v14 = vld [vmem:[%s3339_s4 + $0x70] sm:$0xff] }
 0x903   :  { %v1644_v46 = vsub.f32 %v3190_v56, %v1628_v35 }
 0x904   :  { %v2515_v22 = vpop.eup %2514 }
 0x905   :  { %v1624_v12 = vmul.f32 0.6931472, %v2515_v22  ;;  %v1740_v51 = vsel %vm1724_vm0, %v1644_v46, 0.0  ;;  %v1786_v46 = vld [vmem:[%s3339_s4 + $0x68] sm:$0xff] }
 0x907   :  { %v1642_v42 = vsub.f32 %v3194_v34, %v1624_v12  ;;  %v1773_v34 = vld [vmem:[%s3339_s4] sm:$0xff] }
 0x909   :  { %v1738_v4 = vsel %vm1722_vm15, %v1642_v42, 0.0 }
 0x90a   :  { %1767 = vadd.xlane.f32.xlu1 %v1738_v4 }
 0x90e   :  { %1771 = vadd.xlane.f32.xlu1 %v1740_v51 }
 0x929   :  { %v1742_v49 = vpop.xlane.xlu1 %1741 }
 0x92a   :  { %v1789_v43 = vmul.f32 %v1773_v34, %v1742_v49 }
 0x92c   :  { %v1806_v61 = vsel %vm1805_vm1, %v1789_v43, 0.0 }
 0x92d   :  { %v1748_v57 = vpop.xlane.xlu1 %1747 }
 0x92e   :  { %v1792_v16 = vmul.f32 %v1776_v9, %v1748_v57 }
 0x92f   :  { %v1744_v41 = vpop.xlane.xlu0 %1743 }
 0x930   :  { %v1790_v7 = vmul.f32 %v1774_v32, %v1744_v41  ;;  %v1811_v3 = vsel %vm1805_vm1, %v1792_v16, 0.0 }
 0x932   :  { %v1807_v53 = vsel %vm1805_vm1, %v1790_v7, 0.0  ;;  %v1788_v7 = vld [vmem:[%s3339_s4 + $0x78] sm:$0xff] }
 0x933   :  { %v1746_v56 = vpop.xlane.xlu0 %1745  ;;  %v1808_v62 = vadd.f32 %v1807_v53, %v1806_v61 }
 0x934   :  { %v1791_v1 = vmul.f32 %v1775_v37, %v1746_v56 }
 0x936   :  { %v1809_v54 = vsel %vm1805_vm1, %v1791_v1, 0.0 }
 0x937   :  { %v1810_v20 = vadd.f32 %v1809_v54, %v1808_v62 }
 0x939   :  { %v1812_v59 = vadd.f32 %v1811_v3, %v1810_v20 }
 0x93c   :  { %v1752_v8 = vpop.xlane.xlu1 %1751 }
 0x93d   :  { %v1750_v58 = vpop.xlane.xlu0 %1749  ;;  %v1794_v10 = vmul.f32 %v1778_v0, %v1752_v8 }
 0x93e   :  { %v1793_v5 = vmul.f32 %v1777_v2, %v1750_v58 }
 0x93f   :  { %v1815_v31 = vsel %vm1805_vm1, %v1794_v10, 0.0 }
 0x940   :  { %v1813_v36 = vsel %vm1805_vm1, %v1793_v5, 0.0  ;;  %v1756_v44 = vpop.xlane.xlu1 %1755 }
 0x941   :  { %v1754_v17 = vpop.xlane.xlu0 %1753  ;;  %v1814_v15 = vadd.f32 %v1813_v36, %v1812_v59  ;;  %v1796_v40 = vmul.f32 %v1780_v18, %v1756_v44 }
 0x942   :  { %v1795_v29 = vmul.f32 %v1779_v19, %v1754_v17 }
 0x943   :  { %v1816_v38 = vadd.f32 %v1815_v31, %v1814_v15  ;;  %v1819_v63 = vsel %vm1805_vm1, %v1796_v40, 0.0 }
 0x944   :  { %v1817_v50 = vsel %vm1805_vm1, %v1795_v29, 0.0 }
 0x945   :  { %v1818_v6 = vadd.f32 %v1817_v50, %v1816_v38 }
 0x947   :  { %v1820_v23 = vadd.f32 %v1819_v63, %v1818_v6 }
 0x94b   :  { %v1760_v48 = vpop.xlane.xlu1 %1759 }
 0x94c   :  { %v1798_v24 = vmul.f32 %v1782_v33, %v1760_v48 }
 0x94d   :  { %v1758_v45 = vpop.xlane.xlu0 %1757 }
 0x94e   :  { %v1797_v11 = vmul.f32 %v1781_v21, %v1758_v45  ;;  %v1823_v52 = vsel %vm1805_vm1, %v1798_v24, 0.0 }
 0x94f   :  { %v1764_v47 = vpop.xlane.xlu1 %1763 }
 0x950   :  { %v1821_v60 = vsel %vm1805_vm1, %v1797_v11, 0.0  ;;  %v1800_v35 = vmul.f32 %v1784_v26, %v1764_v47 }
 0x951   :  { %v1762_v13 = vpop.xlane.xlu0 %1761  ;;  %v1822_v25 = vadd.f32 %v1821_v60, %v1820_v23 }
 0x952   :  { %v1799_v55 = vmul.f32 %v1783_v30, %v1762_v13  ;;  %v1827_v51 = vsel %vm1805_vm1, %v1800_v35, 0.0 }
 0x953   :  { %v1824_v27 = vadd.f32 %v1823_v52, %v1822_v25 }
 0x954   :  { %v1825_v22 = vsel %vm1805_vm1, %v1799_v55, 0.0 }
 0x955   :  { %v1826_v42 = vadd.f32 %v1825_v22, %v1824_v27 }
 0x957   :  { %v1828_v32 = vadd.f32 %v1827_v51, %v1826_v42 }
 0x95d   :  { %v1766_v39 = vpop.xlane.xlu0 %1765 }
 0x95e   :  { %v1801_v12 = vmul.f32 %v1785_v28, %v1766_v39 }
 0x960   :  { %v1829_v41 = vsel %vm1805_vm1, %v1801_v12, 0.0 }
 0x961   :  { %v1770_v4 = vpop.xlane.xlu0 %1769  ;;  %v1830_v56 = vadd.f32 %v1829_v41, %v1828_v32 }
 0x962   :  { %v1803_v49 = vmul.f32 %v1787_v14, %v1770_v4 }
 0x964   :  { %v1833_v9 = vsel %vm1805_vm1, %v1803_v49, 0.0 }
 0x997   :  { %v1768_v34 = vpop.xlane.xlu1 %1767 }
 0x998   :  { %v1802_v37 = vmul.f32 %v1786_v46, %v1768_v34 }
 0x99a   :  { %v1831_v43 = vsel %vm1805_vm1, %v1802_v37, 0.0 }
 0x99b   :  { %v1832_v1 = vadd.f32 %v1831_v43, %v1830_v56  ;;  %v1772_v53 = vpop.xlane.xlu1 %1771 }
 0x99c   :  { %v1804_v57 = vmul.f32 %v1788_v7, %v1772_v53 }
 0x99d   :  { %v1834_v2 = vadd.f32 %v1833_v9, %v1832_v1 }
 0x99e   :  { %v1835_v58 = vsel %vm1805_vm1, %v1804_v57, 0.0 }
 0x99f   :  { %v1836_v61 = vadd.f32 %v1835_v58, %v1834_v2 }
 0x9a1   :  { %1837 = vadd.xlane.f32.xlu0 %v1836_v61 }
 0xa2e   :  { %v1838_v54 = vpop.xlane.xlu0 %1837 }
 0xa2f   :  { %v1839_v62 = vrot.slane %v1838_v54, 4 }
 0xa31   :  { %v1840_v16 = vadd.f32 %v1839_v62, %v1838_v54 }
 0xa33   :  { %v1841_v5 = vrot.slane %v1840_v16, 2 }
 0xa35   :  { %v1842_v20 = vadd.f32 %v1841_v5, %v1840_v16 }
 0xa37   :  { %v1843_v0 = vrot.slane %v1842_v20, 1 }
 0xa39   :  { %v1844_v8 = vadd.f32 %v1843_v0, %v1842_v20 }
 0xa3b   :  { %2315 = vpush %v1844_v8 }
 0xa6c   :  { %s2316_s4 = spop %2315 }
 0xa6d   :  { %s1846_s1 = ssub.f32 0.0, %s2316_s4 }
 0xa6f   :  { %1848 = sst [smem:[#allocation5]] %s1846_s1 }
 0xa70   :  { %2547 = shalt.err (!%p2544_p10)
}
 0xa71   :  { %s2556_s26 = smov [#allocation5]  }
 0xa72   :  { %1856 = dma.smem_to_hbm %s2556_s26, 16, %s3341_s6, [#allocation4]  }
 0xa73   :  { %2550 = dma.done.wait [#allocation4], 16  }
 0xa74   :  { %2551 = vsyncadd [#allocation4], 4294967280 }
 0xa75   :  { %1860 = sfence }
 0xa76   :  { %1861 = vsyncpa [#allocation3], 1 }
 0xa77   :  { %1862 = vsyncpa [#allocation4], 1 }

</bundles_post_ra>
